<compile_context>
chip_gen: v7x
topology: tpu7x:2x2x1
jax: 0.10.0
libtpu: 0.0.40
codegen_flags: <defaults>
</compile_context>

<pallas_src>
import functools

import jax
import jax.numpy as jnp
from jax.experimental import pallas as pl
from jax.experimental.pallas import tpu as pltpu

LN_EPS = 1e-5
_MM_DTYPE = jnp.bfloat16  # MXU operand dtype (accumulation stays f32)


def _round_up(x, m):
    return ((x + m - 1) // m) * m


def _msa_transition_kernel(m_ref, mask_ref, g_ref, b_ref,
                           w1_ref, b1_ref, w2_ref, b2_ref, out_ref,
                           *, hidden_chunk):
    # m_ref    : [TR, C_m]   block of flattened MSA rows
    # mask_ref : [TR, 1]     (f32)
    tr, c_m = m_ref.shape
    n_hidden = w1_ref.shape[-1]

    x = m_ref[...].astype(jnp.float32)

    # ---- LayerNorm over channels (single fused stats pass) ----
    inv_c = 1.0 / c_m
    s1 = jnp.sum(x, axis=-1, keepdims=True)
    s2 = jnp.sum(x * x, axis=-1, keepdims=True)
    mu = s1 * inv_c
    var = jnp.maximum(s2 * inv_c - mu * mu, 0.0)
    x_ln = (x - mu) * jax.lax.rsqrt(var + LN_EPS) * g_ref[...] + b_ref[...]
    x_mm = x_ln.astype(_MM_DTYPE)  # bf16 MXU operand

    # ---- Linear -> ReLU -> Linear, chunked over the hidden dimension ----
    acc = jnp.zeros((tr, c_m), jnp.float32)
    for start in range(0, n_hidden, hidden_chunk):
        end = min(start + hidden_chunk, n_hidden)
        h = jnp.dot(x_mm, w1_ref[:, start:end],
                    preferred_element_type=jnp.float32)
        h = jnp.maximum(h + b1_ref[:, start:end], 0.0)
        acc = acc + jnp.dot(h.astype(_MM_DTYPE), w2_ref[start:end, :],
                            preferred_element_type=jnp.float32)
    y = acc + b2_ref[...]

    # ---- mask (broadcast over channels) ----
    y = y * mask_ref[...]

    out_ref[...] = y.astype(out_ref.dtype)


def msa_transition(m, mask, params, *, block_rows=1024, hidden_chunk=512):
    """Pallas MSATransition forward.

    m    : [*, N_seq, N_res, C_m]
    mask : [*, N_seq, N_res] or None
    returns [*, N_seq, N_res, C_m] in m.dtype
    """
    orig_shape = m.shape
    c_m = orig_shape[-1]
    n_hidden = params["w1"].shape[-1]

    if mask is None:
        mask = jnp.ones(orig_shape[:-1], jnp.float32)

    # Flatten all leading dims into a single row axis (free reshape, no transpose).
    rows = 1
    for d in orig_shape[:-1]:
        rows *= d
    m2 = m.reshape(rows, c_m)
    mask2 = mask.reshape(rows, 1).astype(jnp.float32)

    # Row tile: multiple of 8, capped at block_rows.  For large inputs shrink so
    # there are >=4 row blocks (megacore sharding / pipelining); no padding of
    # the MSA tensor -- the grid handles the partial last block.
    tr = min(block_rows, _round_up(rows, 8))
    if rows >= 4 * 256:
        tr = min(tr, _round_up(pl.cdiv(rows, 4), 8))
    grid = (pl.cdiv(rows, tr),)

    # Hidden-dim chunk: prefer a 128-multiple that divides n_hidden.
    hc = n_hidden
    if n_hidden > hidden_chunk:
        hc = hidden_chunk
        for c in (512, 384, 256, 128):
            if c <= hidden_chunk and n_hidden % c == 0:
                hc = c
                break

    # Parameter preparation: weights in bf16 (MXU operands), vectors in f32.
    gamma = params["gamma"].reshape(1, c_m).astype(jnp.float32)
    beta = params["beta"].reshape(1, c_m).astype(jnp.float32)
    w1 = params["w1"].astype(_MM_DTYPE)
    b1 = params["b1"].reshape(1, n_hidden).astype(jnp.float32)
    w2 = params["w2"].astype(_MM_DTYPE)
    b2 = params["b2"].reshape(1, c_m).astype(jnp.float32)

    def const_spec(shape):
        return pl.BlockSpec(shape, lambda i, _n=len(shape): (0,) * _n)

    itemsize = jnp.dtype(m.dtype).itemsize
    cost = pl.CostEstimate(
        flops=int(4 * rows * c_m * n_hidden),
        transcendentals=int(rows),
        bytes_accessed=int(rows * c_m * itemsize * 2        # read m + write out
                           + rows * 4                        # mask
                           + 2 * c_m * n_hidden * 2          # bf16 weights
                           + 2 * (c_m + n_hidden) * 4),      # f32 biases/LN
    )

    kernel = functools.partial(_msa_transition_kernel, hidden_chunk=hc)

    out = pl.pallas_call(
        kernel,
        out_shape=jax.ShapeDtypeStruct((rows, c_m), m.dtype),
        grid=grid,
        in_specs=[
            pl.BlockSpec((tr, c_m), lambda i: (i, 0)),      # MSA rows
            pl.BlockSpec((tr, 1), lambda i: (i, 0)),        # mask rows
            const_spec((1, c_m)),                           # LN gamma
            const_spec((1, c_m)),                           # LN beta
            const_spec((c_m, n_hidden)),                    # W1 (bf16)
            const_spec((1, n_hidden)),                      # b1
            const_spec((n_hidden, c_m)),                    # W2 (bf16)
            const_spec((1, c_m)),                           # b2
        ],
        out_specs=pl.BlockSpec((tr, c_m), lambda i: (i, 0)),
        compiler_params=pltpu.CompilerParams(
            dimension_semantics=("parallel",),
            vmem_limit_bytes=48 * 1024 * 1024,
        ),
        cost_estimate=cost,
    )(m2, mask2, gamma, beta, w1, b1, w2, b2)

    return out.reshape(orig_shape)


def reference(m, mask, params):
    """Pure-JAX re-implementation of the PyTorch forward (for verification)."""
    if mask is None:
        mask = jnp.ones(m.shape[:-1], m.dtype)
    mask = mask[..., None]
    mu = jnp.mean(m, axis=-1, keepdims=True)
    var = jnp.mean(jnp.square(m - mu), axis=-1, keepdims=True)
    x = (m - mu) * jax.lax.rsqrt(var + LN_EPS) * params["gamma"] + params["beta"]
    x = jax.nn.relu(x @ params["w1"] + params["b1"])
    x = (x @ params["w2"] + params["b2"]) * mask
    return x


if __name__ == "__main__":
    key = jax.random.PRNGKey(0)
    B, N_seq, N_res = 2, 8, 16
    c_m, n = 32, 4
    n_hidden = n * c_m

    keys = jax.random.split(key, 8)
    m = jax.random.normal(keys[0], (B, N_seq, N_res, c_m), jnp.float32)
    msa_mask = (jax.random.uniform(keys[1], (B, N_seq, N_res)) > 0.2).astype(jnp.float32)

    def w(k, shape, scale=0.1):
        return scale * jax.random.normal(k, shape, jnp.float32)

    # TODO(synk): AlphaFold-style init schemes ('relu'/'final') are replaced by
    # deterministic random weights of the correct shapes (synthetic weights).
    params = dict(
        gamma=jnp.ones((1, c_m), jnp.float32) + w(keys[2], (1, c_m)),
        beta=w(keys[3], (1, c_m)),
        w1=w(keys[4], (c_m, n_hidden)),
        b1=w(keys[5], (1, n_hidden)),
        w2=w(keys[6], (n_hidden, c_m)),
        b2=w(keys[7], (1, c_m)),
    )

    out = msa_transition(m, msa_mask, params)
    out = jax.block_until_ready(out)

    ref = reference(m, msa_mask, params)
    assert out.shape == (B, N_seq, N_res, c_m)
    assert out.dtype == m.dtype
    max_err = float(jnp.max(jnp.abs(out - ref)))
    assert jnp.allclose(out, ref, atol=2e-2, rtol=2e-2), f"max abs err {max_err}"

    # Also exercise the mask=None default path.
    out_nomask = jax.block_until_ready(msa_transition(m, None, params))
    ref_nomask = reference(m, None, params)
    assert jnp.allclose(out_nomask, ref_nomask, atol=2e-2, rtol=2e-2)

    print("KERNEL_OK")
</pallas_src>

<mosaic_0001>
module attributes {stable_mosaic.version = 11 : i64} {
  func.func @_msa_transition_kernel(%arg0: i32, %arg1: memref<256x32xf32, #tpu.memory_space<vmem>>, %arg2: memref<256x1xf32, #tpu.memory_space<vmem>>, %arg3: memref<1x32xf32, #tpu.memory_space<vmem>>, %arg4: memref<1x32xf32, #tpu.memory_space<vmem>>, %arg5: memref<32x128xbf16, #tpu.memory_space<vmem>>, %arg6: memref<1x128xf32, #tpu.memory_space<vmem>>, %arg7: memref<128x32xbf16, #tpu.memory_space<vmem>>, %arg8: memref<1x32xf32, #tpu.memory_space<vmem>>, %arg9: memref<256x32xf32, #tpu.memory_space<vmem>>) attributes {dimension_semantics = [#tpu.dimension_semantics<parallel>], iteration_bounds = array<i64: 1>, scalar_prefetch = 0 : i64, scratch_operands = 0 : i64, tpu.core_type = #tpu.core_type<tc>, window_params = [{transform_indices = @transform_0, window_bounds = array<i64: 256, 32>}, {transform_indices = @transform_1, window_bounds = array<i64: 256, 1>}, {pipeline_mode = #tpu.pipeline_mode<synchronous>, transform_indices = @transform_2, window_bounds = array<i64: 1, 32>}, {pipeline_mode = #tpu.pipeline_mode<synchronous>, transform_indices = @transform_3, window_bounds = array<i64: 1, 32>}, {pipeline_mode = #tpu.pipeline_mode<synchronous>, transform_indices = @transform_4, window_bounds = array<i64: 32, 128>}, {pipeline_mode = #tpu.pipeline_mode<synchronous>, transform_indices = @transform_5, window_bounds = array<i64: 1, 128>}, {pipeline_mode = #tpu.pipeline_mode<synchronous>, transform_indices = @transform_6, window_bounds = array<i64: 128, 32>}, {pipeline_mode = #tpu.pipeline_mode<synchronous>, transform_indices = @transform_7, window_bounds = array<i64: 1, 32>}, {transform_indices = @transform_8, window_bounds = array<i64: 256, 32>}]} {
    %c0 = arith.constant 0 : index
    %c0_0 = arith.constant 0 : index
    %0 = vector.load %arg1[%c0, %c0_0] : memref<256x32xf32, #tpu.memory_space<vmem>>, vector<256x32xf32>
    %cst = arith.constant dense<0.000000e+00> : vector<256xf32>
    %1 = vector.multi_reduction <add>, %0, %cst [1] : vector<256x32xf32> to vector<256xf32>
    %2 = vector.shape_cast %1 : vector<256xf32> to vector<256x1xf32>
    %3 = arith.mulf %0, %0 : vector<256x32xf32>
    %cst_1 = arith.constant dense<0.000000e+00> : vector<256xf32>
    %4 = vector.multi_reduction <add>, %3, %cst_1 [1] : vector<256x32xf32> to vector<256xf32>
    %5 = vector.shape_cast %4 : vector<256xf32> to vector<256x1xf32>
    %cst_2 = arith.constant 3.125000e-02 : f32
    %6 = vector.broadcast %cst_2 : f32 to vector<256x1xf32>
    %7 = arith.mulf %2, %6 : vector<256x1xf32>
    %cst_3 = arith.constant 3.125000e-02 : f32
    %8 = vector.broadcast %cst_3 : f32 to vector<256x1xf32>
    %9 = arith.mulf %5, %8 : vector<256x1xf32>
    %10 = arith.mulf %7, %7 : vector<256x1xf32>
    %11 = arith.subf %9, %10 : vector<256x1xf32>
    %cst_4 = arith.constant 0.000000e+00 : f32
    %12 = vector.broadcast %cst_4 : f32 to vector<256x1xf32>
    %13 = arith.maximumf %11, %12 : vector<256x1xf32>
    %14 = vector.broadcast %7 : vector<256x1xf32> to vector<256x32xf32>
    %15 = arith.subf %0, %14 : vector<256x32xf32>
    %cst_5 = arith.constant 9.99999974E-6 : f32
    %16 = vector.broadcast %cst_5 : f32 to vector<256x1xf32>
    %17 = arith.addf %13, %16 : vector<256x1xf32>
    %18 = math.rsqrt %17 : vector<256x1xf32>
    %19 = vector.broadcast %18 : vector<256x1xf32> to vector<256x32xf32>
    %20 = arith.mulf %15, %19 : vector<256x32xf32>
    %c0_6 = arith.constant 0 : index
    %c0_7 = arith.constant 0 : index
    %21 = vector.load %arg3[%c0_6, %c0_7] : memref<1x32xf32, #tpu.memory_space<vmem>>, vector<1x32xf32>
    %22 = vector.broadcast %21 : vector<1x32xf32> to vector<256x32xf32>
    %23 = arith.mulf %20, %22 : vector<256x32xf32>
    %c0_8 = arith.constant 0 : index
    %c0_9 = arith.constant 0 : index
    %24 = vector.load %arg4[%c0_8, %c0_9] : memref<1x32xf32, #tpu.memory_space<vmem>>, vector<1x32xf32>
    %25 = vector.broadcast %24 : vector<1x32xf32> to vector<256x32xf32>
    %26 = arith.addf %23, %25 : vector<256x32xf32>
    %27 = arith.truncf %26 : vector<256x32xf32> to vector<256x32xbf16>
    %cst_10 = arith.constant 0.000000e+00 : f32
    %28 = vector.broadcast %cst_10 : f32 to vector<256x32xf32>
    %c0_11 = arith.constant 0 : index
    %c0_12 = arith.constant 0 : index
    %29 = vector.load %arg5[%c0_11, %c0_12] : memref<32x128xbf16, #tpu.memory_space<vmem>>, vector<32x128xbf16>
    %cst_13 = arith.constant dense<0.000000e+00> : vector<256x128xf32>
    %30 = tpu.matmul %27, %29, %cst_13 {dimension_numbers = #tpu.dot_dimension_numbers<[1], [0], [0], [1], [0, 0, 1, 1], [], []>} : vector<256x32xbf16>, vector<32x128xbf16>, vector<256x128xf32> -> vector<256x128xf32>
    %c0_14 = arith.constant 0 : index
    %c0_15 = arith.constant 0 : index
    %31 = vector.load %arg6[%c0_14, %c0_15] : memref<1x128xf32, #tpu.memory_space<vmem>>, vector<1x128xf32>
    %32 = vector.broadcast %31 : vector<1x128xf32> to vector<256x128xf32>
    %33 = arith.addf %30, %32 : vector<256x128xf32>
    %cst_16 = arith.constant 0.000000e+00 : f32
    %34 = vector.broadcast %cst_16 : f32 to vector<256x128xf32>
    %35 = arith.maximumf %33, %34 : vector<256x128xf32>
    %36 = arith.truncf %35 : vector<256x128xf32> to vector<256x128xbf16>
    %c0_17 = arith.constant 0 : index
    %c0_18 = arith.constant 0 : index
    %37 = vector.load %arg7[%c0_17, %c0_18] : memref<128x32xbf16, #tpu.memory_space<vmem>>, vector<128x32xbf16>
    %cst_19 = arith.constant dense<0.000000e+00> : vector<256x32xf32>
    %38 = tpu.matmul %36, %37, %cst_19 {dimension_numbers = #tpu.dot_dimension_numbers<[1], [0], [0], [1], [0, 0, 1, 1], [], []>} : vector<256x128xbf16>, vector<128x32xbf16>, vector<256x32xf32> -> vector<256x32xf32>
    %39 = arith.addf %28, %38 : vector<256x32xf32>
    %c0_20 = arith.constant 0 : index
    %c0_21 = arith.constant 0 : index
    %40 = vector.load %arg8[%c0_20, %c0_21] : memref<1x32xf32, #tpu.memory_space<vmem>>, vector<1x32xf32>
    %41 = vector.broadcast %40 : vector<1x32xf32> to vector<256x32xf32>
    %42 = arith.addf %39, %41 : vector<256x32xf32>
    %c0_22 = arith.constant 0 : index
    %c0_23 = arith.constant 0 : index
    %43 = vector.load %arg2[%c0_22, %c0_23] : memref<256x1xf32, #tpu.memory_space<vmem>>, vector<256x1xf32>
    %44 = vector.broadcast %43 : vector<256x1xf32> to vector<256x32xf32>
    %45 = arith.mulf %42, %44 : vector<256x32xf32>
    %c0_24 = arith.constant 0 : index
    %c0_25 = arith.constant 0 : index
    %46 = vector.load %arg9[%c0_24, %c0_25] : memref<256x32xf32, #tpu.memory_space<vmem>>, vector<256x32xf32>
    tpu.vector_store %arg9[%c0_24, %c0_25], %45 {strides = array<i32>} : memref<256x32xf32, #tpu.memory_space<vmem>>, vector<256x32xf32>,
    return
  }
  func.func @transform_0(%arg0: i32) -> (i32, i32) {
    %c0_i32 = arith.constant 0 : i32
    %c0_i32_0 = arith.constant 0 : i32
    return %arg0, %c0_i32 : i32, i32
  }
  func.func @transform_1(%arg0: i32) -> (i32, i32) {
    %c0_i32 = arith.constant 0 : i32
    %c0_i32_0 = arith.constant 0 : i32
    return %arg0, %c0_i32 : i32, i32
  }
  func.func @transform_2(%arg0: i32) -> (i32, i32) {
    %c0_i32 = arith.constant 0 : i32
    %c0_i32_0 = arith.constant 0 : i32
    %c0_i32_1 = arith.constant 0 : i32
    return %c0_i32, %c0_i32_0 : i32, i32
  }
  func.func @transform_3(%arg0: i32) -> (i32, i32) {
    %c0_i32 = arith.constant 0 : i32
    %c0_i32_0 = arith.constant 0 : i32
    %c0_i32_1 = arith.constant 0 : i32
    return %c0_i32, %c0_i32_0 : i32, i32
  }
  func.func @transform_4(%arg0: i32) -> (i32, i32) {
    %c0_i32 = arith.constant 0 : i32
    %c0_i32_0 = arith.constant 0 : i32
    %c0_i32_1 = arith.constant 0 : i32
    return %c0_i32, %c0_i32_0 : i32, i32
  }
  func.func @transform_5(%arg0: i32) -> (i32, i32) {
    %c0_i32 = arith.constant 0 : i32
    %c0_i32_0 = arith.constant 0 : i32
    %c0_i32_1 = arith.constant 0 : i32
    return %c0_i32, %c0_i32_0 : i32, i32
  }
  func.func @transform_6(%arg0: i32) -> (i32, i32) {
    %c0_i32 = arith.constant 0 : i32
    %c0_i32_0 = arith.constant 0 : i32
    %c0_i32_1 = arith.constant 0 : i32
    return %c0_i32, %c0_i32_0 : i32, i32
  }
  func.func @transform_7(%arg0: i32) -> (i32, i32) {
    %c0_i32 = arith.constant 0 : i32
    %c0_i32_0 = arith.constant 0 : i32
    %c0_i32_1 = arith.constant 0 : i32
    return %c0_i32, %c0_i32_0 : i32, i32
  }
  func.func @transform_8(%arg0: i32) -> (i32, i32) {
    %c0_i32 = arith.constant 0 : i32
    %c0_i32_0 = arith.constant 0 : i32
    return %arg0, %c0_i32 : i32, i32
  }
}

</mosaic_0001>

<bundles_post_ra>
// kernel: tpu_custom_call.1
= control target key start
LH: loop header
LB: loop body
LE: loop exit
PB: predicated region body
PF: predicated region fallthrough
CT: control target
= control target key end

     0   :  { %vm62_vm0 = vcmask 261120   ;;  %s2683_s0 = inlined_call_operand.vmem [shape: f32[256,32], index: 0, kind: input, shape index: {}]   ;;  %s2684_s4 = inlined_call_operand.vmem [shape: bf16[32,128], index: 4, kind: input, shape index: {}]   ;;  %s2685_s2 = inlined_call_operand.vmem [shape: f32[1,32], index: 2, kind: input, shape index: {}]   ;;  %s2686_s3 = inlined_call_operand.vmem [shape: f32[1,32], index: 3, kind: input, shape index: {}]   ;;  %s2687_s6 = inlined_call_operand.vmem [shape: bf16[128,32], index: 6, kind: input, shape index: {}]   ;;  %s2688_s1 = inlined_call_operand.vmem [shape: f32[256,1], index: 1, kind: input, shape index: {}]   ;;  %s2689_s5 = inlined_call_operand.vmem [shape: f32[1,128], index: 5, kind: input, shape index: {}]   ;;  %s2690_s7 = inlined_call_operand.vmem [shape: f32[1,32], index: 7, kind: input, shape index: {}]   ;;  %s2691_s8 = inlined_call_operand.vmem [shape: f32[256,32], index: 8, kind: output, shape index: {}]  }
   0x1   :  { %v1746_v0 = vld [vmem:[%s2683_s0 + $0x10] sm:$0xff]  ;;  %v1751_v1 = vld [vmem:[%s2683_s0] sm:$0xff]  ;;  %v1756_v2 = vld [vmem:[%s2683_s0 + $0x18] sm:$0xff] }
   0x2   :  { %v69_v3 = vsel %vm62_vm0, %v1746_v0, 0.0  ;;  %v63_v4 = vsel %vm62_vm0, %v1751_v1, 0.0  ;;  %v1765_v5 = vld [vmem:[%s2683_s0 + $0x8] sm:$0xff]  ;;  %v72_v6 = vsel %vm62_vm0, %v1756_v2, 0.0  ;;  %v159_v9 = vmul.f32 %v1751_v1, %v1751_v1  ;;  %v1791_v17 = vld [vmem:[%s2683_s0 + $0x20] sm:$0xff]  ;;  %v1800_v20 = vld [vmem:[%s2683_s0 + $0x38] sm:$0xff] }
   0x3   :  { %70 = vadd.xlane.f32.xlu1 %v69_v3  ;;  %64 = vadd.xlane.f32.xlu0 %v63_v4  ;;  %v66_v7 = vsel %vm62_vm0, %v1765_v5, 0.0  ;;  %v160_v8 = vmul.f32 %v1765_v5, %v1765_v5  ;;  %v162_v12 = vmul.f32 %v1756_v2, %v1756_v2  ;;  %v161_v13 = vmul.f32 %v1746_v0, %v1746_v0  ;;  %v1786_v16 = vld [vmem:[%s2683_s0 + $0x28] sm:$0xff]  ;;  %v1805_v21 = vld [vmem:[%s2683_s0 + $0x30] sm:$0xff]  ;;  %v1831_v33 = vld [vmem:[%s2683_s0 + $0x40] sm:$0xff] }
   0x4   :  { %v191_v11 = vsel %vm62_vm0, %v159_v9, 0.0  ;;  %v78_v18 = vsel %vm62_vm0, %v1786_v16, 0.0  ;;  %v75_v19 = vsel %vm62_vm0, %v1791_v17, 0.0  ;;  %v84_v22 = vsel %vm62_vm0, %v1800_v20, 0.0  ;;  %v1826_v32 = vld [vmem:[%s2683_s0 + $0x48] sm:$0xff]  ;;  %v1840_v36 = vld [vmem:[%s2683_s0 + $0x58] sm:$0xff] }
   0x5   :  { %v194_v10 = vsel %vm62_vm0, %v160_v8, 0.0  ;;  %v200_v14 = vsel %vm62_vm0, %v162_v12, 0.0  ;;  %v197_v15 = vsel %vm62_vm0, %v161_v13, 0.0  ;;  %v81_v23 = vsel %vm62_vm0, %v1805_v21, 0.0  ;;  %v1845_v37 = vld [vmem:[%s2683_s0 + $0x50] sm:$0xff]  ;;  %v1866_v48 = vld [vmem:[%s2683_s0 + $0x68] sm:$0xff] }
   0x6   :  { %v164_v24 = vmul.f32 %v1786_v16, %v1786_v16  ;;  %v163_v25 = vmul.f32 %v1791_v17, %v1791_v17  ;;  %v166_v28 = vmul.f32 %v1800_v20, %v1800_v20  ;;  %v165_v29 = vmul.f32 %v1805_v21, %v1805_v21  ;;  %v1871_v49 = vld [vmem:[%s2683_s0 + $0x60] sm:$0xff]  ;;  %v1883_v53 = vld [vmem:[%s2683_s0 + $0x78] sm:$0xff]  ;;  %v1888_v54 = vld [vmem:[%s2683_s0 + $0x70] sm:$0xff] }
   0x7   :  { %73 = vadd.xlane.f32.xlu1 %v72_v6  ;;  %67 = vadd.xlane.f32.xlu0 %v66_v7  ;;  %v90_v34 = vsel %vm62_vm0, %v1826_v32, 0.0  ;;  %v87_v35 = vsel %vm62_vm0, %v1831_v33, 0.0  ;;  %v96_v38 = vsel %vm62_vm0, %v1840_v36, 0.0  ;;  %v93_v39 = vsel %vm62_vm0, %v1845_v37, 0.0  ;;  %v1616_v50 = vld [vmem:[%s2684_s4] sm:$0xff]   ;;  %v1617_v55 = vld [vmem:[%s2684_s4 + $0x8] sm:$0xff]  }
   0x8   :  { %v206_v26 = vsel %vm62_vm0, %v164_v24, 0.0  ;;  %v203_v27 = vsel %vm62_vm0, %v163_v25, 0.0  ;;  %v212_v30 = vsel %vm62_vm0, %v166_v28, 0.0  ;;  %v209_v31 = vsel %vm62_vm0, %v165_v29, 0.0  ;;  %1513 = vmatprep.subr.bf16.mxu0 %v1616_v50  ;;  %v1912_v6 = vld [vmem:[%s2683_s0 + $0x88] sm:$0xff]  ;;  %v1917_v7 = vld [vmem:[%s2683_s0 + $0x80] sm:$0xff] }
   0x9   :  { %v168_v40 = vmul.f32 %v1826_v32, %v1826_v32  ;;  %v167_v41 = vmul.f32 %v1831_v33, %v1831_v33  ;;  %v170_v44 = vmul.f32 %v1840_v36, %v1840_v36  ;;  %v169_v45 = vmul.f32 %v1845_v37, %v1845_v37  ;;  %1514 = vmatpush3.bf16.msra.mxu0 %v1616_v50 }
   0xa   :  { %v102_v51 = vsel %vm62_vm0, %v1866_v48, 0.0  ;;  %v99_v52 = vsel %vm62_vm0, %v1871_v49, 0.0  ;;  %v108_v56 = vsel %vm62_vm0, %v1883_v53, 0.0  ;;  %v105_v57 = vsel %vm62_vm0, %v1888_v54, 0.0  ;;  %1515 = vmatprep.subr.bf16.mxu0 %v1617_v55 }
   0xb   :  { %195 = vadd.xlane.f32.xlu1 %v194_v10  ;;  %192 = vadd.xlane.f32.xlu0 %v191_v11  ;;  %v218_v42 = vsel %vm62_vm0, %v168_v40, 0.0  ;;  %v215_v43 = vsel %vm62_vm0, %v167_v41, 0.0  ;;  %v224_v46 = vsel %vm62_vm0, %v170_v44, 0.0  ;;  %v221_v47 = vsel %vm62_vm0, %v169_v45, 0.0  ;;  %v1926_v10 = vld [vmem:[%s2683_s0 + $0x98] sm:$0xff]  ;;  %v1931_v11 = vld [vmem:[%s2683_s0 + $0x90] sm:$0xff] }
   0xc   :  { %v172_v58 = vmul.f32 %v1866_v48, %v1866_v48  ;;  %v171_v59 = vmul.f32 %v1871_v49, %v1871_v49  ;;  %v174_v62 = vmul.f32 %v1883_v53, %v1883_v53  ;;  %v173_v63 = vmul.f32 %v1888_v54, %v1888_v54 }
   0xd   :  { %1516 = vmatpush3.bf16.msra.mxu0 %v1617_v55  ;;  %v114_v8 = vsel %vm62_vm0, %v1912_v6, 0.0  ;;  %v111_v9 = vsel %vm62_vm0, %v1917_v7, 0.0  ;;  %v120_v12 = vsel %vm62_vm0, %v1926_v10, 0.0  ;;  %v117_v13 = vsel %vm62_vm0, %v1931_v11, 0.0  ;;  %v56_v55 = vld [vmem:[%s2683_s0 + $0xd0] sm:$0xff] }
   0xe   :  { %v230_v60 = vsel %vm62_vm0, %v172_v58, 0.0  ;;  %v227_v61 = vsel %vm62_vm0, %v171_v59, 0.0  ;;  %v236_v3 = vsel %vm62_vm0, %v174_v62, 0.0  ;;  %v233_v4 = vsel %vm62_vm0, %v173_v63, 0.0 }
   0xf   :  { %201 = vadd.xlane.f32.xlu1 %v200_v14  ;;  %198 = vadd.xlane.f32.xlu0 %v197_v15  ;;  %v176_v14 = vmul.f32 %v1912_v6, %v1912_v6  ;;  %v175_v15 = vmul.f32 %v1917_v7, %v1917_v7  ;;  %v185_v63 = vmul.f32 %v56_v55, %v56_v55 }
  0x13   :  { %79 = vadd.xlane.f32.xlu1 %v78_v18  ;;  %76 = vadd.xlane.f32.xlu0 %v75_v19  ;;  %v242_v18 = vsel %vm62_vm0, %v176_v14, 0.0  ;;  %v239_v19 = vsel %vm62_vm0, %v175_v15, 0.0  ;;  %v61_v14 = vld [vmem:[%s2683_s0 + $0xf8] sm:$0xff]  ;;  %v60_v15 = vld [vmem:[%s2683_s0 + $0xf0] sm:$0xff] }
  0x17   :  { %85 = vadd.xlane.f32.xlu1 %v84_v22  ;;  %82 = vadd.xlane.f32.xlu0 %v81_v23  ;;  %v178_v22 = vmul.f32 %v1926_v10, %v1926_v10  ;;  %v177_v23 = vmul.f32 %v1931_v11, %v1931_v11 }
  0x19   :  { %v248_v24 = vsel %vm62_vm0, %v178_v22, 0.0  ;;  %v245_v25 = vsel %vm62_vm0, %v177_v23, 0.0 }
  0x1b   :  { %207 = vadd.xlane.f32.xlu1 %v206_v26  ;;  %204 = vadd.xlane.f32.xlu0 %v203_v27  ;;  %v1952_v26 = vld [vmem:[%s2683_s0 + $0xa8] sm:$0xff]  ;;  %v1957_v27 = vld [vmem:[%s2683_s0 + $0xa0] sm:$0xff] }
  0x1c   :  { %v126_v28 = vsel %vm62_vm0, %v1952_v26, 0.0  ;;  %v123_v29 = vsel %vm62_vm0, %v1957_v27, 0.0 }
  0x1f   :  { %213 = vadd.xlane.f32.xlu1 %v212_v30  ;;  %210 = vadd.xlane.f32.xlu0 %v209_v31  ;;  %v1966_v30 = vld [vmem:[%s2683_s0 + $0xb8] sm:$0xff]  ;;  %v1971_v31 = vld [vmem:[%s2683_s0 + $0xb0] sm:$0xff] }
  0x23   :  { %91 = vadd.xlane.f32.xlu1 %v90_v34  ;;  %88 = vadd.xlane.f32.xlu0 %v87_v35  ;;  %v132_v34 = vsel %vm62_vm0, %v1966_v30, 0.0  ;;  %v129_v35 = vsel %vm62_vm0, %v1971_v31, 0.0 }
  0x27   :  { %97 = vadd.xlane.f32.xlu1 %v96_v38  ;;  %94 = vadd.xlane.f32.xlu0 %v93_v39  ;;  %v180_v38 = vmul.f32 %v1952_v26, %v1952_v26  ;;  %v179_v39 = vmul.f32 %v1957_v27, %v1957_v27 }
  0x29   :  { %v254_v40 = vsel %vm62_vm0, %v180_v38, 0.0  ;;  %v251_v41 = vsel %vm62_vm0, %v179_v39, 0.0 }
  0x2b   :  { %219 = vadd.xlane.f32.xlu1 %v218_v42  ;;  %216 = vadd.xlane.f32.xlu0 %v215_v43  ;;  %v182_v42 = vmul.f32 %v1966_v30, %v1966_v30  ;;  %v181_v43 = vmul.f32 %v1971_v31, %v1971_v31 }
  0x2d   :  { %v260_v44 = vsel %vm62_vm0, %v182_v42, 0.0  ;;  %v257_v45 = vsel %vm62_vm0, %v181_v43, 0.0 }
  0x2f   :  { %225 = vadd.xlane.f32.xlu1 %v224_v46  ;;  %222 = vadd.xlane.f32.xlu0 %v221_v47  ;;  %v1992_v46 = vld [vmem:[%s2683_s0 + $0xc8] sm:$0xff]  ;;  %v54_v47 = vld [vmem:[%s2683_s0 + $0xc0] sm:$0xff] }
  0x30   :  { %v138_v50 = vsel %vm62_vm0, %v1992_v46, 0.0  ;;  %v184_v58 = vmul.f32 %v1992_v46, %v1992_v46  ;;  %v183_v59 = vmul.f32 %v54_v47, %v54_v47 }
  0x33   :  { %103 = vadd.xlane.f32.xlu1 %v102_v51  ;;  %100 = vadd.xlane.f32.xlu0 %v99_v52  ;;  %v135_v51 = vsel %vm62_vm0, %v54_v47, 0.0  ;;  %v57_v52 = vld [vmem:[%s2683_s0 + $0xd8] sm:$0xff] }
  0x34   :  { %v186_v62 = vmul.f32 %v57_v52, %v57_v52 }
  0x37   :  { %109 = vadd.xlane.f32.xlu1 %v108_v56  ;;  %106 = vadd.xlane.f32.xlu0 %v105_v57  ;;  %v144_v56 = vsel %vm62_vm0, %v57_v52, 0.0  ;;  %v141_v57 = vsel %vm62_vm0, %v56_v55, 0.0 }
  0x3b   :  { %231 = vadd.xlane.f32.xlu1 %v230_v60  ;;  %228 = vadd.xlane.f32.xlu0 %v227_v61  ;;  %v266_v60 = vsel %vm62_vm0, %v184_v58, 0.0  ;;  %v263_v61 = vsel %vm62_vm0, %v183_v59, 0.0 }
  0x3f   :  { %237 = vadd.xlane.f32.xlu1 %v236_v3  ;;  %234 = vadd.xlane.f32.xlu0 %v233_v4  ;;  %v272_v3 = vsel %vm62_vm0, %v186_v62, 0.0  ;;  %v269_v4 = vsel %vm62_vm0, %v185_v63, 0.0 }
  0x43   :  { %115 = vadd.xlane.f32.xlu1 %v114_v8  ;;  %112 = vadd.xlane.f32.xlu0 %v111_v9  ;;  %v59_v8 = vld [vmem:[%s2683_s0 + $0xe8] sm:$0xff]  ;;  %v58_v9 = vld [vmem:[%s2683_s0 + $0xe0] sm:$0xff] }
  0x44   :  { %v188_v22 = vmul.f32 %v59_v8, %v59_v8  ;;  %v187_v23 = vmul.f32 %v58_v9, %v58_v9 }
  0x47   :  { %121 = vadd.xlane.f32.xlu1 %v120_v12  ;;  %118 = vadd.xlane.f32.xlu0 %v117_v13  ;;  %v150_v12 = vsel %vm62_vm0, %v59_v8, 0.0  ;;  %v147_v13 = vsel %vm62_vm0, %v58_v9, 0.0 }
  0x4b   :  { %243 = vadd.xlane.f32.xlu1 %v242_v18  ;;  %240 = vadd.xlane.f32.xlu0 %v239_v19  ;;  %v156_v18 = vsel %vm62_vm0, %v61_v14, 0.0  ;;  %v153_v19 = vsel %vm62_vm0, %v60_v15, 0.0 }
  0x4f   :  { %249 = vadd.xlane.f32.xlu1 %v248_v24  ;;  %246 = vadd.xlane.f32.xlu0 %v245_v25  ;;  %v278_v24 = vsel %vm62_vm0, %v188_v22, 0.0  ;;  %v275_v25 = vsel %vm62_vm0, %v187_v23, 0.0 }
  0x53   :  { %127 = vadd.xlane.f32.xlu1 %v126_v28  ;;  %124 = vadd.xlane.f32.xlu0 %v123_v29  ;;  %v190_v28 = vmul.f32 %v61_v14, %v61_v14  ;;  %v189_v29 = vmul.f32 %v60_v15, %v60_v15 }
  0x57   :  { %133 = vadd.xlane.f32.xlu1 %v132_v34  ;;  %130 = vadd.xlane.f32.xlu0 %v129_v35  ;;  %v284_v34 = vsel %vm62_vm0, %v190_v28, 0.0  ;;  %v281_v35 = vsel %vm62_vm0, %v189_v29, 0.0 }
  0x5b   :  { %255 = vadd.xlane.f32.xlu1 %v254_v40  ;;  %252 = vadd.xlane.f32.xlu0 %v251_v41 }
  0x5f   :  { %261 = vadd.xlane.f32.xlu1 %v260_v44  ;;  %258 = vadd.xlane.f32.xlu0 %v257_v45 }
  0x63   :  { %139 = vadd.xlane.f32.xlu1 %v138_v50  ;;  %136 = vadd.xlane.f32.xlu0 %v135_v51 }
  0x67   :  { %145 = vadd.xlane.f32.xlu1 %v144_v56  ;;  %142 = vadd.xlane.f32.xlu0 %v141_v57 }
  0x6b   :  { %267 = vadd.xlane.f32.xlu1 %v266_v60  ;;  %264 = vadd.xlane.f32.xlu0 %v263_v61 }
  0x6f   :  { %273 = vadd.xlane.f32.xlu1 %v272_v3  ;;  %270 = vadd.xlane.f32.xlu0 %v269_v4 }
  0x73   :  { %151 = vadd.xlane.f32.xlu1 %v150_v12  ;;  %148 = vadd.xlane.f32.xlu0 %v147_v13 }
  0x77   :  { %157 = vadd.xlane.f32.xlu1 %v156_v18  ;;  %154 = vadd.xlane.f32.xlu0 %v153_v19 }
  0x7b   :  { %279 = vadd.xlane.f32.xlu1 %v278_v24  ;;  %276 = vadd.xlane.f32.xlu0 %v275_v25 }
  0x7f   :  { %285 = vadd.xlane.f32.xlu1 %v284_v34  ;;  %282 = vadd.xlane.f32.xlu0 %v281_v35 }
  0x90   :  { %v71_v38 = vpop.xlane.xlu1 %70  ;;  %v65_v39 = vpop.xlane.xlu0 %64 }
  0x91   :  { %v2034_v42 = vmul.f32 0.03125, %v65_v39  ;;  %v2036_v44 = vmul.f32 0.03125, %v71_v38 }
  0x93   :  { %v351_v51 = vmul.f32 %v2034_v42, %v2034_v42  ;;  %v353_v59 = vmul.f32 %v2036_v44, %v2036_v44 }
  0x94   :  { %v74_v40 = vpop.xlane.xlu1 %73  ;;  %v68_v41 = vpop.xlane.xlu0 %67 }
  0x95   :  { %v288_v43 = vmul.f32 0.03125, %v68_v41  ;;  %v2038_v45 = vmul.f32 0.03125, %v74_v40 }
  0x97   :  { %v352_v52 = vmul.f32 %v288_v43, %v288_v43  ;;  %v354_v60 = vmul.f32 %v2038_v45, %v2038_v45 }
  0x98   :  { %v196_v47 = vpop.xlane.xlu1 %195  ;;  %v193_v50 = vpop.xlane.xlu0 %192 }
  0x99   :  { %v320_v55 = vmul.f32 0.03125, %v196_v47  ;;  %v319_v56 = vmul.f32 0.03125, %v193_v50 }
  0x9b   :  { %v384_v57 = vsub.f32 %v320_v55, %v352_v52  ;;  %v383_v58 = vsub.f32 %v319_v56, %v351_v51  ;;  %v2061_v52 = vld [vmem:[%s2685_s2] ss:$0 sm:$0xff]  ;;  %v448_v55 = vsub.f32 %v1765_v5, %v288_v43 }
  0x9c   :  { %v202_v61 = vpop.xlane.xlu1 %201  ;;  %v199_v62 = vpop.xlane.xlu0 %198  ;;  %v2067_v56 = vld [vmem:[%s2687_s6] sm:$0xff]  }
  0x9d   :  { %v416_v63 = vmax.f32 %v384_v57, 0.0  ;;  %v415_v3 = vmax.f32 %v383_v58, 0.0  ;;  %v322_v4 = vmul.f32 0.03125, %v202_v61  ;;  %v321_v8 = vmul.f32 0.03125, %v199_v62  ;;  %v2074_v61 = vld [vmem:[%s2686_s3] ss:$0 sm:$0xff]  ;;  %1549 = vmatprep.subr.bf16.mxu0 %v2067_v56  ;;  %1597 = vmatprep.subr.bf16.mxu1 %v2067_v56 }
  0x9e   :  { %v447_v58 = vsub.f32 %v1751_v1, %v2034_v42  ;;  %v2084_v1 = vld [vmem:[%s2687_s6 + $0x8] sm:$0xff]   ;;  %1605 = vmatpush3.bf16.msra.mxu1 %v2067_v56 }
  0x9f   :  { %v480_v9 = vadd.f32 1e-05, %v416_v63  ;;  %v479_v12 = vadd.f32 1e-05, %v415_v3  ;;  %v386_v13 = vsub.f32 %v322_v4, %v354_v60  ;;  %v385_v14 = vsub.f32 %v321_v8, %v353_v59  ;;  %1598 = vmatprep.subr.bf16.mxu1 %v2084_v1 }
  0xa0   :  { %v80_v15 = vpop.xlane.xlu1 %79  ;;  %v77_v18 = vpop.xlane.xlu0 %76 }
  0xa1   :  { %1626 = vrsqrt.f32 %v480_v9  ;;  %v418_v19 = vmax.f32 %v386_v13, 0.0  ;;  %v417_v22 = vmax.f32 %v385_v14, 0.0  ;;  %v2046_v29 = vmul.f32 0.03125, %v80_v15 }
  0xa2   :  { %1628 = vrsqrt.f32 %v479_v12  ;;  %v2048_v34 = vmul.f32 0.03125, %v77_v18  ;;  %v450_v13 = vsub.f32 %v1756_v2, %v2038_v45  ;;  %v2099_v45 = vld [vmem:[%s2687_s6 + $0x10] sm:$0xff]   ;;  %1606 = vmatpush3.bf16.msra.mxu1 %v2084_v1 }
  0xa3   :  { %v482_v23 = vadd.f32 1e-05, %v418_v19  ;;  %v481_v24 = vadd.f32 1e-05, %v417_v22  ;;  %v356_v41 = vmul.f32 %v2046_v29, %v2046_v29  ;;  %1599 = vmatprep.subr.bf16.mxu1 %v2099_v45 }
  0xa4   :  { %v86_v25 = vpop.xlane.xlu1 %85  ;;  %v83_v28 = vpop.xlane.xlu0 %82  ;;  %v355_v47 = vmul.f32 %v2048_v34, %v2048_v34 }
  0xa5   :  { %1630 = vrsqrt.f32 %v482_v23  ;;  %v2050_v35 = vmul.f32 0.03125, %v86_v25  ;;  %v2052_v38 = vmul.f32 0.03125, %v83_v28  ;;  %v449_v28 = vsub.f32 %v1746_v0, %v2036_v44 }
  0xa6   :  { %1632 = vrsqrt.f32 %v481_v24  ;;  %1607 = vmatpush3.bf16.msra.mxu1 %v2099_v45 }
  0xa7   :  { %v358_v5 = vmul.f32 %v2050_v35, %v2050_v35  ;;  %v357_v43 = vmul.f32 %v2052_v38, %v2052_v38 }
  0xa8   :  { %v208_v39 = vpop.xlane.xlu1 %207  ;;  %v205_v40 = vpop.xlane.xlu0 %204 }
  0xa9   :  { %v324_v50 = vmul.f32 0.03125, %v208_v39  ;;  %v323_v51 = vmul.f32 0.03125, %v205_v40 }
  0xab   :  { %v1627_v57 = vpop.eup %1626  ;;  %v388_v59 = vsub.f32 %v324_v50, %v356_v41  ;;  %v387_v60 = vsub.f32 %v323_v51, %v355_v47 }
  0xac   :  { %v1629_v62 = vpop.eup %1628  ;;  %v214_v63 = vpop.xlane.xlu1 %213  ;;  %v544_v4 = vmul.f32 %v1627_v57, %v448_v55 }
  0xad   :  { %v211_v3 = vpop.xlane.xlu0 %210  ;;  %v420_v42 = vmax.f32 %v388_v59, 0.0  ;;  %v419_v8 = vmax.f32 %v387_v60, 0.0  ;;  %v326_v9 = vmul.f32 0.03125, %v214_v63  ;;  %v543_v14 = vmul.f32 %v1629_v62, %v447_v58 }
  0xae   :  { %v325_v12 = vmul.f32 0.03125, %v211_v3  ;;  %v583_v15 = vmul.f32 %v2061_v52, %v544_v4 }
  0xaf   :  { %v1631_v18 = vpop.eup %1630  ;;  %v484_v19 = vadd.f32 1e-05, %v420_v42  ;;  %v483_v22 = vadd.f32 1e-05, %v419_v8  ;;  %v390_v23 = vsub.f32 %v326_v9, %v358_v5  ;;  %v582_v41 = vmul.f32 %v2061_v52, %v543_v14  ;;  %v2108_v5 = vld [vmem:[%s2687_s6 + $0x18] sm:$0xff]   ;;  %v2127_v14 = vld [vmem:[%s2687_s6 + $0x20] sm:$0xff]  }
  0xb0   :  { %v389_v24 = vsub.f32 %v325_v12, %v357_v43  ;;  %v1633_v25 = vpop.eup %1632  ;;  %v92_v39 = vpop.xlane.xlu1 %91  ;;  %v622_v2 = vadd.f32 %v2074_v61, %v583_v15  ;;  %v546_v51 = vmul.f32 %v1631_v18, %v450_v13  ;;  %1600 = vmatprep.subr.bf16.mxu1 %v2108_v5 }
  0xb1   :  { %v89_v40 = vpop.xlane.xlu0 %88  ;;  %1634 = vrsqrt.f32 %v484_v19  ;;  %v422_v47 = vmax.f32 %v390_v23, 0.0  ;;  %v621_v0 = vadd.f32 %v2074_v61, %v582_v41  ;;  %v545_v44 = vmul.f32 %v1633_v25, %v449_v28  ;;  %1608 = vmatpush3.bf16.msra.mxu1 %v2108_v5 }
  0xb2   :  { %v421_v50 = vmax.f32 %v389_v24, 0.0  ;;  %1636 = vrsqrt.f32 %v483_v22  ;;  %v2110_v43 = vmul.f32 0.03125, %v92_v39  ;;  %v2112_v63 = vmul.f32 0.03125, %v89_v40  ;;  %1601 = vmatprep.subr.bf16.mxu1 %v2127_v14 }
  0xb3   :  { %v486_v55 = vadd.f32 1e-05, %v422_v47  ;;  %v653_v59 = vpack.c.bf16 %v622_v2, %v621_v0  ;;  %v584_v62 = vmul.f32 %v2061_v52, %v545_v44  ;;  %v585_v3 = vmul.f32 %v2061_v52, %v546_v51  ;;  %v2147_v51 = vld [vmem:[%s2687_s6 + $0x28] sm:$0xff]  }
  0xb4   :  { %v485_v57 = vadd.f32 1e-05, %v421_v50  ;;  %v98_v58 = vpop.xlane.xlu1 %97  ;;  %v360_v15 = vmul.f32 %v2110_v43, %v2110_v43  ;;  %v359_v18 = vmul.f32 %v2112_v63, %v2112_v63  ;;  %v452_v23 = vsub.f32 %v1786_v16, %v2046_v29 }
  0xb5   :  { %v95_v60 = vpop.xlane.xlu0 %94  ;;  %1638 = vrsqrt.f32 %v486_v55  ;;  %1517 = vmatprep.mubr.msk.bf16.mxu0 %vm62_vm0, %v653_v59  ;;  %v623_v4 = vadd.f32 %v2074_v61, %v584_v62  ;;  %v2119_v42 = vmul.f32 0.03125, %v98_v58  ;;  %v624_v12 = vadd.f32 %v2074_v61, %v585_v3  ;;  %1609 = vmatpush3.bf16.msra.mxu1 %v2127_v14 }
  0xb6   :  { %1640 = vrsqrt.f32 %v485_v57  ;;  %v2121_v8 = vmul.f32 0.03125, %v95_v60  ;;  %v451_v41 = vsub.f32 %v1791_v17, %v2048_v34  ;;  %v454_v34 = vsub.f32 %v1800_v20, %v2050_v35  ;;  %1602 = vmatprep.subr.bf16.mxu1 %v2147_v51 }
  0xb7   :  { %v654_v24 = vpack.c.bf16 %v624_v12, %v623_v4  ;;  %v362_v2 = vmul.f32 %v2119_v42, %v2119_v42 }
  0xb8   :  { %v220_v9 = vpop.xlane.xlu1 %219  ;;  %v361_v47 = vmul.f32 %v2121_v8, %v2121_v8 }
  0xb9   :  { %v217_v13 = vpop.xlane.xlu0 %216  ;;  %v328_v19 = vmul.f32 0.03125, %v220_v9  ;;  %1518 = vmatmul.mubr.msk.bf16.vlgmr.msra.gmra.mrb[0].mxu0 %vm62_vm0, %v654_v24  ;;  %1610 = vmatpush3.bf16.msra.mxu1 %v2147_v51 }
  0xba   :  { %v327_v22 = vmul.f32 0.03125, %v217_v13  ;;  %1550 = vmatpush3.bf16.msra.mxu0 %v2067_v56  ;;  %v453_v56 = vsub.f32 %v1805_v21, %v2052_v38 }
  0xbb   :  { %v1635_v25 = vpop.eup %1634  ;;  %v392_v28 = vsub.f32 %v328_v19, %v360_v15  ;;  %1551 = vmatprep.subr.bf16.mxu0 %v2084_v1 }
  0xbc   :  { %v391_v39 = vsub.f32 %v327_v22, %v359_v18  ;;  %v1637_v40 = vpop.eup %1636  ;;  %v226_v50 = vpop.xlane.xlu1 %225  ;;  %v548_v29 = vmul.f32 %v1635_v25, %v452_v23 }
  0xbd   :  { %v223_v16 = vpop.xlane.xlu0 %222  ;;  %v424_v0 = vmax.f32 %v392_v28, 0.0  ;;  %v330_v55 = vmul.f32 0.03125, %v226_v50  ;;  %v547_v57 = vmul.f32 %v1637_v40, %v451_v41 }
  0xbe   :  { %v423_v44 = vmax.f32 %v391_v39, 0.0  ;;  %v329_v17 = vmul.f32 0.03125, %v223_v16  ;;  %v587_v58 = vmul.f32 %v2061_v52, %v548_v29  ;;  %1552 = vmatpush3.bf16.msra.mxu0 %v2084_v1 }
  0xbf   :  { %v1639_v59 = vpop.eup %1638  ;;  %v488_v60 = vadd.f32 1e-05, %v424_v0  ;;  %v394_v3 = vsub.f32 %v330_v55, %v362_v2  ;;  %v586_v20 = vmul.f32 %v2061_v52, %v547_v57  ;;  %1553 = vmatprep.subr.bf16.mxu0 %v2099_v45 }
  0xc0   :  { %v487_v62 = vadd.f32 1e-05, %v423_v44  ;;  %v393_v4 = vsub.f32 %v329_v17, %v361_v47  ;;  %v1641_v9 = vpop.eup %1640  ;;  %v104_v12 = vpop.xlane.xlu1 %103  ;;  %v626_v35 = vadd.f32 %v2074_v61, %v587_v58  ;;  %v550_v19 = vmul.f32 %v1639_v59, %v454_v34 }
  0xc1   :  { %v101_v13 = vpop.xlane.xlu0 %100  ;;  %1642 = vrsqrt.f32 %v488_v60  ;;  %v426_v15 = vmax.f32 %v394_v3, 0.0  ;;  %v625_v22 = vadd.f32 %v2074_v61, %v586_v20  ;;  %v549_v23 = vmul.f32 %v1641_v9, %v453_v56 }
  0xc2   :  { %v425_v18 = vmax.f32 %v393_v4, 0.0  ;;  %1644 = vrsqrt.f32 %v487_v62  ;;  %v2165_v40 = vmul.f32 0.03125, %v104_v12  ;;  %v2167_v41 = vmul.f32 0.03125, %v101_v13  ;;  %1554 = vmatpush3.bf16.msra.mxu0 %v2099_v45 }
  0xc3   :  { %v490_v21 = vadd.f32 1e-05, %v426_v15  ;;  %v655_v25 = vpack.c.bf16 %v626_v35, %v625_v22  ;;  %v588_v39 = vmul.f32 %v2061_v52, %v549_v23  ;;  %v589_v1 = vmul.f32 %v2061_v52, %v550_v19  ;;  %1555 = vmatprep.subr.bf16.mxu0 %v2108_v5 }
  0xc4   :  { %v489_v38 = vadd.f32 1e-05, %v425_v18  ;;  %v110_v24 = vpop.xlane.xlu1 %109  ;;  %v364_v44 = vmul.f32 %v2165_v40, %v2165_v40  ;;  %v363_v45 = vmul.f32 %v2167_v41, %v2167_v41  ;;  %v456_v34 = vsub.f32 %v1826_v32, %v2110_v43 }
  0xc5   :  { %v107_v28 = vpop.xlane.xlu0 %106  ;;  %1646 = vrsqrt.f32 %v490_v21  ;;  %1521 = vmatprep.mubr.msk.bf16.mxu0 %vm62_vm0, %v655_v25  ;;  %v627_v2 = vadd.f32 %v2074_v61, %v588_v39  ;;  %v2174_v47 = vmul.f32 0.03125, %v110_v24  ;;  %v628_v29 = vadd.f32 %v2074_v61, %v589_v1 }
  0xc6   :  { %1648 = vrsqrt.f32 %v489_v38  ;;  %v2176_v50 = vmul.f32 0.03125, %v107_v28  ;;  %1556 = vmatpush3.bf16.msra.mxu0 %v2108_v5  ;;  %v455_v3 = vsub.f32 %v1831_v33, %v2112_v63  ;;  %v458_v33 = vsub.f32 %v1840_v36, %v2119_v42 }
  0xc7   :  { %v656_v57 = vpack.c.bf16 %v628_v29, %v627_v2  ;;  %1557 = vmatprep.subr.bf16.mxu0 %v2127_v14  ;;  %v366_v4 = vmul.f32 %v2174_v47, %v2174_v47  ;;  %v457_v38 = vsub.f32 %v1845_v37, %v2121_v8 }
  0xc8   :  { %v232_v16 = vpop.xlane.xlu1 %231  ;;  %v365_v9 = vmul.f32 %v2176_v50, %v2176_v50 }
  0xc9   :  { %v229_v0 = vpop.xlane.xlu0 %228  ;;  %v332_v55 = vmul.f32 0.03125, %v232_v16  ;;  %1522 = vmatmul.mubr.msk.bf16.gmra.mrb[4].mxu0 %vm62_vm0, %v656_v57 }
  0xca   :  { %v331_v17 = vmul.f32 0.03125, %v229_v0  ;;  %1558 = vmatpush3.bf16.msra.mxu0 %v2127_v14 }
  0xcb   :  { %v1643_v58 = vpop.eup %1642  ;;  %v396_v59 = vsub.f32 %v332_v55, %v364_v44  ;;  %1559 = vmatprep.subr.bf16.mxu0 %v2147_v51 }
  0xcc   :  { %v395_v60 = vsub.f32 %v331_v17, %v363_v45  ;;  %v1645_v62 = vpop.eup %1644  ;;  %v238_v5 = vpop.xlane.xlu1 %237  ;;  %v552_v43 = vmul.f32 %v1643_v58, %v456_v34 }
  0xcd   :  { %v235_v32 = vpop.xlane.xlu0 %234  ;;  %v428_v56 = vmax.f32 %v396_v59, 0.0  ;;  %v334_v13 = vmul.f32 0.03125, %v238_v5  ;;  %v551_v63 = vmul.f32 %v1645_v62, %v455_v3  ;;  %v460_v5 = vsub.f32 %v1866_v48, %v2165_v40 }
  0xce   :  { %v427_v12 = vmax.f32 %v395_v60, 0.0  ;;  %v333_v20 = vmul.f32 0.03125, %v235_v32  ;;  %v591_v35 = vmul.f32 %v2061_v52, %v552_v43  ;;  %1560 = vmatpush3.bf16.msra.mxu0 %v2147_v51 }
  0xcf   :  { %v1647_v15 = vpop.eup %1646  ;;  %v492_v18 = vadd.f32 1e-05, %v428_v56  ;;  %v398_v22 = vsub.f32 %v334_v13, %v366_v4  ;;  %v590_v14 = vmul.f32 %v2061_v52, %v551_v63 }
  0xd0   :  { %v491_v19 = vadd.f32 1e-05, %v427_v12  ;;  %v397_v23 = vsub.f32 %v333_v20, %v365_v9  ;;  %v1649_v21 = vpop.eup %1648  ;;  %v116_v24 = vpop.xlane.xlu1 %115  ;;  %v630_v36 = vadd.f32 %v2074_v61, %v591_v35  ;;  %v554_v39 = vmul.f32 %v1647_v15, %v458_v33 }
  0xd1   :  { %v113_v25 = vpop.xlane.xlu0 %112  ;;  %1650 = vrsqrt.f32 %v492_v18  ;;  %v430_v42 = vmax.f32 %v398_v22, 0.0  ;;  %v629_v1 = vadd.f32 %v2074_v61, %v590_v14  ;;  %v553_v2 = vmul.f32 %v1649_v21, %v457_v38 }
  0xd2   :  { %v429_v28 = vmax.f32 %v397_v23, 0.0  ;;  %1652 = vrsqrt.f32 %v491_v19  ;;  %v2206_v45 = vmul.f32 0.03125, %v116_v24  ;;  %v2208_v55 = vmul.f32 0.03125, %v113_v25 }
  0xd3   :  { %v494_v16 = vadd.f32 1e-05, %v430_v42  ;;  %v657_v37 = vpack.c.bf16 %v630_v36, %v629_v1  ;;  %v592_v44 = vmul.f32 %v2061_v52, %v553_v2  ;;  %v593_v17 = vmul.f32 %v2061_v52, %v554_v39 }
  0xd4   :  { %v493_v29 = vadd.f32 1e-05, %v429_v28  ;;  %v122_v0 = vpop.xlane.xlu1 %121  ;;  %v368_v62 = vmul.f32 %v2206_v45, %v2206_v45  ;;  %v367_v3 = vmul.f32 %v2208_v55, %v2208_v55  ;;  %v459_v20 = vsub.f32 %v1871_v49, %v2167_v41 }
  0xd5   :  { %v119_v8 = vpop.xlane.xlu0 %118  ;;  %1654 = vrsqrt.f32 %v494_v16  ;;  %1525 = vmatprep.mubr.msk.bf16.mxu0 %vm62_vm0, %v657_v37  ;;  %v631_v51 = vadd.f32 %v2074_v61, %v592_v44  ;;  %v2213_v34 = vmul.f32 0.03125, %v122_v0  ;;  %v632_v59 = vadd.f32 %v2074_v61, %v593_v17 }
  0xd6   :  { %1656 = vrsqrt.f32 %v493_v29  ;;  %v2215_v57 = vmul.f32 0.03125, %v119_v8  ;;  %v462_v23 = vsub.f32 %v1883_v53, %v2174_v47  ;;  %v461_v42 = vsub.f32 %v1888_v54, %v2176_v50 }
  0xd7   :  { %v658_v32 = vpack.c.bf16 %v632_v59, %v631_v51  ;;  %v370_v33 = vmul.f32 %v2213_v34, %v2213_v34 }
  0xd8   :  { %v244_v58 = vpop.xlane.xlu1 %243  ;;  %v369_v63 = vmul.f32 %v2215_v57, %v2215_v57 }
  0xd9   :  { %v241_v60 = vpop.xlane.xlu0 %240  ;;  %v336_v4 = vmul.f32 0.03125, %v244_v58  ;;  %1526 = vmatmul.mubr.msk.bf16.gmra.mrb[8].mxu0 %vm62_vm0, %v658_v32 }
  0xda   :  { %v335_v9 = vmul.f32 0.03125, %v241_v60 }
  0xdb   :  { %v1651_v43 = vpop.eup %1650  ;;  %v400_v56 = vsub.f32 %v336_v4, %v368_v62 }
  0xdc   :  { %v399_v12 = vsub.f32 %v335_v9, %v367_v3  ;;  %v1653_v13 = vpop.eup %1652  ;;  %v250_v35 = vpop.xlane.xlu1 %249  ;;  %v556_v18 = vmul.f32 %v1651_v43, %v460_v5 }
  0xdd   :  { %v247_v15 = vpop.xlane.xlu0 %246  ;;  %v432_v48 = vmax.f32 %v400_v56, 0.0  ;;  %v338_v19 = vmul.f32 0.03125, %v250_v35  ;;  %v555_v21 = vmul.f32 %v1653_v13, %v459_v20  ;;  %v464_v13 = vsub.f32 %v1912_v6, %v2206_v45 }
  0xde   :  { %v431_v40 = vmax.f32 %v399_v12, 0.0  ;;  %v337_v22 = vmul.f32 0.03125, %v247_v15  ;;  %v595_v49 = vmul.f32 %v2061_v52, %v556_v18  ;;  %v463_v18 = vsub.f32 %v1917_v7, %v2208_v55 }
  0xdf   :  { %v1655_v41 = vpop.eup %1654  ;;  %v496_v38 = vadd.f32 1e-05, %v432_v48  ;;  %v402_v25 = vsub.f32 %v338_v19, %v370_v33  ;;  %v594_v1 = vmul.f32 %v2061_v52, %v555_v21 }
  0xe0   :  { %v495_v24 = vadd.f32 1e-05, %v431_v40  ;;  %v401_v14 = vsub.f32 %v337_v22, %v369_v63  ;;  %v1657_v36 = vpop.eup %1656  ;;  %v128_v28 = vpop.xlane.xlu1 %127  ;;  %v634_v2 = vadd.f32 %v2074_v61, %v595_v49  ;;  %v558_v16 = vmul.f32 %v1655_v41, %v462_v23 }
  0xe1   :  { %v125_v39 = vpop.xlane.xlu0 %124  ;;  %1658 = vrsqrt.f32 %v496_v38  ;;  %v434_v53 = vmax.f32 %v402_v25, 0.0  ;;  %v633_v29 = vadd.f32 %v2074_v61, %v594_v1  ;;  %v557_v0 = vmul.f32 %v1657_v36, %v461_v42 }
  0xe2   :  { %v433_v47 = vmax.f32 %v401_v14, 0.0  ;;  %1660 = vrsqrt.f32 %v495_v24  ;;  %v2240_v50 = vmul.f32 0.03125, %v128_v28  ;;  %v2242_v58 = vmul.f32 0.03125, %v125_v39 }
  0xe3   :  { %v498_v37 = vadd.f32 1e-05, %v434_v53  ;;  %v659_v17 = vpack.c.bf16 %v634_v2, %v633_v29  ;;  %v596_v54 = vmul.f32 %v2061_v52, %v557_v0  ;;  %v597_v59 = vmul.f32 %v2061_v52, %v558_v16 }
  0xe4   :  { %v497_v8 = vadd.f32 1e-05, %v433_v47  ;;  %v134_v44 = vpop.xlane.xlu1 %133  ;;  %v372_v32 = vmul.f32 %v2240_v50, %v2240_v50  ;;  %v371_v43 = vmul.f32 %v2242_v58, %v2242_v58  ;;  %v466_v41 = vsub.f32 %v1926_v10, %v2213_v34 }
  0xe5   :  { %v131_v51 = vpop.xlane.xlu0 %130  ;;  %1662 = vrsqrt.f32 %v498_v37  ;;  %1529 = vmatprep.mubr.msk.bf16.mxu0 %vm62_vm0, %v659_v17  ;;  %v635_v60 = vadd.f32 %v2074_v61, %v596_v54  ;;  %v2247_v62 = vmul.f32 0.03125, %v134_v44  ;;  %v636_v9 = vadd.f32 %v2074_v61, %v597_v59 }
  0xe6   :  { %1664 = vrsqrt.f32 %v497_v8  ;;  %v2249_v3 = vmul.f32 0.03125, %v131_v51  ;;  %v465_v28 = vsub.f32 %v1931_v11, %v2215_v57 }
  0xe7   :  { %v660_v20 = vpack.c.bf16 %v636_v9, %v635_v60  ;;  %v374_v48 = vmul.f32 %v2247_v62, %v2247_v62 }
  0xe8   :  { %v256_v4 = vpop.xlane.xlu1 %255  ;;  %v373_v40 = vmul.f32 %v2249_v3, %v2249_v3 }
  0xe9   :  { %v253_v5 = vpop.xlane.xlu0 %252  ;;  %v340_v56 = vmul.f32 0.03125, %v256_v4  ;;  %1530 = vmatmul.mubr.msk.bf16.gmra.mrb[12].mxu0 %vm62_vm0, %v660_v20  ;;  %v468_v20 = vsub.f32 %v1952_v26, %v2240_v50 }
  0xea   :  { %v339_v12 = vmul.f32 0.03125, %v253_v5 }
  0xeb   :  { %v1659_v33 = vpop.eup %1658  ;;  %v404_v63 = vsub.f32 %v340_v56, %v372_v32 }
  0xec   :  { %v403_v35 = vsub.f32 %v339_v12, %v371_v43  ;;  %v1661_v15 = vpop.eup %1660  ;;  %v262_v19 = vpop.xlane.xlu1 %261  ;;  %v560_v23 = vmul.f32 %v1659_v33, %v464_v13 }
  0xed   :  { %v259_v22 = vpop.xlane.xlu0 %258  ;;  %v436_v6 = vmax.f32 %v404_v63, 0.0  ;;  %v342_v21 = vmul.f32 0.03125, %v262_v19  ;;  %v559_v38 = vmul.f32 %v1661_v15, %v463_v18 }
  0xee   :  { %v435_v45 = vmax.f32 %v403_v35, 0.0  ;;  %v341_v49 = vmul.f32 0.03125, %v259_v22  ;;  %v599_v7 = vmul.f32 %v2061_v52, %v560_v23 }
  0xef   :  { %v1663_v55 = vpop.eup %1662  ;;  %v500_v24 = vadd.f32 1e-05, %v436_v6  ;;  %v406_v14 = vsub.f32 %v342_v21, %v374_v48  ;;  %v598_v2 = vmul.f32 %v2061_v52, %v559_v38  ;;  %v467_v48 = vsub.f32 %v1957_v27, %v2242_v58 }
  0xf0   :  { %v499_v25 = vadd.f32 1e-05, %v435_v45  ;;  %v405_v36 = vsub.f32 %v341_v49, %v373_v40  ;;  %v1665_v42 = vpop.eup %1664  ;;  %v140_v39 = vpop.xlane.xlu1 %139  ;;  %v638_v53 = vadd.f32 %v2074_v61, %v599_v7  ;;  %v562_v47 = vmul.f32 %v1663_v55, %v466_v41 }
  0xf1   :  { %v137_v1 = vpop.xlane.xlu0 %136  ;;  %1666 = vrsqrt.f32 %v500_v24  ;;  %v438_v10 = vmax.f32 %v406_v14, 0.0  ;;  %v637_v16 = vadd.f32 %v2074_v61, %v598_v2  ;;  %v561_v29 = vmul.f32 %v1665_v42, %v465_v28 }
  0xf2   :  { %v437_v34 = vmax.f32 %v405_v36, 0.0  ;;  %1668 = vrsqrt.f32 %v499_v25  ;;  %v2274_v57 = vmul.f32 0.03125, %v140_v39  ;;  %v2276_v51 = vmul.f32 0.03125, %v137_v1 }
  0xf3   :  { %v502_v0 = vadd.f32 1e-05, %v438_v10  ;;  %v661_v44 = vpack.c.bf16 %v638_v53, %v637_v16  ;;  %v600_v11 = vmul.f32 %v2061_v52, %v561_v29  ;;  %v601_v54 = vmul.f32 %v2061_v52, %v562_v47 }
  0xf4   :  { %v501_v37 = vadd.f32 1e-05, %v437_v34  ;;  %v146_v8 = vpop.xlane.xlu1 %145  ;;  %v376_v43 = vmul.f32 %v2274_v57, %v2274_v57  ;;  %v375_v56 = vmul.f32 %v2276_v51, %v2276_v51  ;;  %v470_v49 = vsub.f32 %v1966_v30, %v2247_v62 }
  0xf5   :  { %v143_v17 = vpop.xlane.xlu0 %142  ;;  %1670 = vrsqrt.f32 %v502_v0  ;;  %1533 = vmatprep.mubr.msk.bf16.mxu0 %vm62_vm0, %v661_v44  ;;  %v639_v59 = vadd.f32 %v2074_v61, %v600_v11  ;;  %v2281_v60 = vmul.f32 0.03125, %v146_v8  ;;  %v640_v5 = vadd.f32 %v2074_v61, %v601_v54 }
  0xf6   :  { %1672 = vrsqrt.f32 %v501_v37  ;;  %v2283_v4 = vmul.f32 0.03125, %v143_v17  ;;  %v469_v14 = vsub.f32 %v1971_v31, %v2249_v3 }
  0xf7   :  { %v662_v33 = vpack.c.bf16 %v640_v5, %v639_v59  ;;  %v378_v40 = vmul.f32 %v2281_v60, %v2281_v60 }
  0xf8   :  { %v268_v9 = vpop.xlane.xlu1 %267  ;;  %v377_v19 = vmul.f32 %v2283_v4, %v2283_v4 }
  0xf9   :  { %v265_v32 = vpop.xlane.xlu0 %264  ;;  %v344_v12 = vmul.f32 0.03125, %v268_v9  ;;  %1534 = vmatmul.mubr.msk.bf16.gmra.mrb[16].mxu0 %vm62_vm0, %v662_v33 }
  0xfa   :  { %v343_v13 = vmul.f32 0.03125, %v265_v32 }
  0xfb   :  { %v1667_v63 = vpop.eup %1666  ;;  %v408_v35 = vsub.f32 %v344_v12, %v376_v43 }
  0xfc   :  { %v407_v15 = vsub.f32 %v343_v13, %v375_v56  ;;  %v1669_v18 = vpop.eup %1668  ;;  %v274_v22 = vpop.xlane.xlu1 %273  ;;  %v564_v6 = vmul.f32 %v1667_v63, %v468_v20  ;;  %v472_v56 = vsub.f32 %v1992_v46, %v2274_v57 }
  0xfd   :  { %v271_v23 = vpop.xlane.xlu0 %270  ;;  %v440_v26 = vmax.f32 %v408_v35, 0.0  ;;  %v346_v45 = vmul.f32 0.03125, %v274_v22  ;;  %v563_v41 = vmul.f32 %v1669_v18, %v467_v48  ;;  %v1690_v35 = vld [vmem:[%s2683_s0 + $0xc0] sm:$0xff] }
  0xfe   :  { %v439_v50 = vmax.f32 %v407_v15, 0.0  ;;  %v345_v21 = vmul.f32 0.03125, %v271_v23  ;;  %v603_v27 = vmul.f32 %v2061_v52, %v564_v6  ;;  %v471_v15 = vsub.f32 %v1690_v35, %v2276_v51 }
  0xff   :  { %v1671_v58 = vpop.eup %1670  ;;  %v504_v38 = vadd.f32 1e-05, %v440_v26  ;;  %v410_v55 = vsub.f32 %v346_v45, %v378_v40  ;;  %v602_v28 = vmul.f32 %v2061_v52, %v563_v41  ;;  %v1691_v26 = vld [vmem:[%s2683_s0 + $0xd8] sm:$0xff] }
 0x100   :  { %v503_v7 = vadd.f32 1e-05, %v439_v50  ;;  %v409_v24 = vsub.f32 %v345_v21, %v377_v19  ;;  %v1673_v25 = vpop.eup %1672  ;;  %v152_v36 = vpop.xlane.xlu1 %151  ;;  %v642_v39 = vadd.f32 %v2074_v61, %v603_v27  ;;  %v566_v1 = vmul.f32 %v1671_v58, %v470_v49  ;;  %v1692_v50 = vld [vmem:[%s2683_s0 + $0xd0] sm:$0xff] }
 0x101   :  { %v149_v42 = vpop.xlane.xlu0 %148  ;;  %1674 = vrsqrt.f32 %v504_v38  ;;  %v442_v30 = vmax.f32 %v410_v55, 0.0  ;;  %v641_v2 = vadd.f32 %v2074_v61, %v602_v28  ;;  %v565_v53 = vmul.f32 %v1673_v25, %v469_v14  ;;  %v1624_v14 = vld [vmem:[%s2687_s6 + $0x30] sm:$0xff]  }
 0x102   :  { %v441_v62 = vmax.f32 %v409_v24, 0.0  ;;  %1676 = vrsqrt.f32 %v503_v7  ;;  %v2308_v3 = vmul.f32 0.03125, %v152_v36  ;;  %v2310_v0 = vmul.f32 0.03125, %v149_v42  ;;  %1561 = vmatprep.subr.bf16.mxu0 %v1624_v14  ;;  %1603 = vmatprep.subr.bf16.mxu1 %v1624_v14 }
 0x103   :  { %v506_v10 = vadd.f32 1e-05, %v442_v30  ;;  %v663_v16 = vpack.c.bf16 %v642_v39, %v641_v2  ;;  %v604_v31 = vmul.f32 %v2061_v52, %v565_v53  ;;  %v605_v37 = vmul.f32 %v2061_v52, %v566_v1  ;;  %1562 = vmatpush3.bf16.msra.mxu0 %v1624_v14  ;;  %1611 = vmatpush3.bf16.msra.mxu1 %v1624_v14 }
 0x104   :  { %v505_v34 = vadd.f32 1e-05, %v441_v62  ;;  %v158_v47 = vpop.xlane.xlu1 %157  ;;  %v380_v9 = vmul.f32 %v2308_v3, %v2308_v3  ;;  %v379_v5 = vmul.f32 %v2310_v0, %v2310_v0  ;;  %v474_v51 = vsub.f32 %v1691_v26, %v2281_v60  ;;  %v1181_v26 = vld [vmem:[%s2688_s1] sm:$0xff] }
 0x105   :  { %v155_v29 = vpop.xlane.xlu0 %154  ;;  %1678 = vrsqrt.f32 %v506_v10  ;;  %1537 = vmatprep.mubr.msk.bf16.mxu0 %vm62_vm0, %v663_v16  ;;  %v643_v8 = vadd.f32 %v2074_v61, %v604_v31  ;;  %v2315_v44 = vmul.f32 0.03125, %v158_v47  ;;  %v644_v54 = vadd.f32 %v2074_v61, %v605_v37  ;;  %v1625_v10 = vld [vmem:[%s2687_s6 + $0x38] sm:$0xff]   ;;  %v1693_v16 = vld [vmem:[%s2683_s0 + $0xe8] sm:$0xff]  ;;  %v1694_v37 = vld [vmem:[%s2683_s0 + $0xe0] sm:$0xff] }
 0x106   :  { %1680 = vrsqrt.f32 %v505_v34  ;;  %v2317_v17 = vmul.f32 0.03125, %v155_v29  ;;  %v473_v45 = vsub.f32 %v1692_v50, %v2283_v4  ;;  %1563 = vmatprep.subr.bf16.mxu0 %v1625_v10  ;;  %1604 = vmatprep.subr.bf16.mxu1 %v1625_v10  ;;  %v476_v29 = vsub.f32 %v1693_v16, %v2308_v3  ;;  %v1696_v3 = vld [vmem:[%s2683_s0 + $0xf0] sm:$0xff]  ;;  %v1193_v50 = vld [vmem:[%s2688_s1 + $0x60] sm:$0xff] }
 0x107   :  { %v664_v12 = vpack.c.bf16 %v644_v54, %v643_v8  ;;  %v382_v18 = vmul.f32 %v2315_v44, %v2315_v44  ;;  %1564 = vmatpush3.bf16.msra.mxu0 %v1625_v10  ;;  %1612 = vmatpush3.bf16.msra.mxu1 %v1625_v10  ;;  %v475_v8 = vsub.f32 %v1694_v37, %v2310_v0  ;;  %v1209_v10 = vld [vmem:[%s2688_s1 + $0xe0] sm:$0xff]  ;;  %v1211_v37 = vld [vmem:[%s2688_s1 + $0xf0] sm:$0xff] }
 0x108   :  { %v280_v11 = vpop.xlane.xlu1 %279  ;;  %v381_v48 = vmul.f32 %v2317_v17, %v2317_v17 }
 0x109   :  { %v277_v59 = vpop.xlane.xlu0 %276  ;;  %v348_v32 = vmul.f32 0.03125, %v280_v11  ;;  %1538 = vmatmul.mubr.msk.bf16.gmra.mrb[20].mxu0 %vm62_vm0, %v664_v12 }
 0x10a   :  { %v347_v43 = vmul.f32 0.03125, %v277_v59 }
 0x10b   :  { %v1675_v13 = vpop.eup %1674  ;;  %v412_v20 = vsub.f32 %v348_v32, %v380_v9  ;;  %v1695_v9 = vld [vmem:[%s2683_s0 + $0xf8] sm:$0xff] }
 0x10c   :  { %v411_v33 = vsub.f32 %v347_v43, %v379_v5  ;;  %v1677_v63 = vpop.eup %1676  ;;  %v286_v46 = vpop.xlane.xlu1 %285  ;;  %v568_v40 = vmul.f32 %v1675_v13, %v472_v56  ;;  %v478_v5 = vsub.f32 %v1695_v9, %v2315_v44  ;;  %v477_v56 = vsub.f32 %v1696_v3, %v2317_v17 }
 0x10d   :  { %v283_v57 = vpop.xlane.xlu0 %282  ;;  %v444_v19 = vmax.f32 %v412_v20, 0.0  ;;  %v350_v23 = vmul.f32 0.03125, %v286_v46  ;;  %v567_v21 = vmul.f32 %v1677_v63, %v471_v15  ;;  %v1697_v46 = vmov 0  }
 0x10e   :  { %v443_v22 = vmax.f32 %v411_v33, 0.0  ;;  %v349_v6 = vmul.f32 0.03125, %v283_v57  ;;  %v607_v49 = vmul.f32 %v2061_v52, %v568_v40  ;;  %1615 = vset.pattern.permute.xlu1 %v1697_v46  ;;  %v1182_v57 = vld [vmem:[%s2688_s1 + $0x8] sm:$0xff]  ;;  %1614 = vset.pattern.permute.xlu0 %v1697_v46  ;;  %v1185_v40 = vld [vmem:[%s2688_s1 + $0x20] sm:$0xff] }
 0x10f   :  { %v1679_v41 = vpop.eup %1678  ;;  %v508_v27 = vadd.f32 1e-05, %v444_v19  ;;  %v414_v38 = vsub.f32 %v350_v23, %v382_v18  ;;  %v606_v24 = vmul.f32 %v2061_v52, %v567_v21  ;;  %1220 = vperm.xlu1 %1615, %v1182_v57   ;;  %v1186_v19 = vld [vmem:[%s2688_s1 + $0x28] sm:$0xff]  ;;  %v1188_v23 = vld [vmem:[%s2688_s1 + $0x38] sm:$0xff]  ;;  %1215 = vperm.xlu0 %1614, %v1181_v26   ;;  %v1197_v21 = vld [vmem:[%s2688_s1 + $0x80] sm:$0xff] }
 0x110   :  { %v507_v58 = vadd.f32 1e-05, %v443_v22  ;;  %v413_v7 = vsub.f32 %v349_v6, %v381_v48  ;;  %v1681_v55 = vpop.eup %1680  ;;  %v646_v25 = vadd.f32 %v2074_v61, %v607_v49  ;;  %v570_v60 = vmul.f32 %v1679_v41, %v474_v51  ;;  %v1187_v22 = vld [vmem:[%s2688_s1 + $0x30] sm:$0xff]  ;;  %v1189_v6 = vld [vmem:[%s2688_s1 + $0x40] sm:$0xff] }
 0x111   :  { %1682 = vrsqrt.f32 %v508_v27  ;;  %v446_v4 = vmax.f32 %v414_v38, 0.0  ;;  %v569_v42 = vmul.f32 %v1681_v55, %v473_v45  ;;  %v645_v28 = vadd.f32 %v2074_v61, %v606_v24  ;;  %v1191_v51 = vld [vmem:[%s2688_s1 + $0x50] sm:$0xff]  ;;  %v1201_v41 = vld [vmem:[%s2688_s1 + $0xa0] sm:$0xff]  ;;  %v1190_v27 = vld [vmem:[%s2688_s1 + $0x48] sm:$0xff] }
 0x112   :  { %v445_v36 = vmax.f32 %v413_v7, 0.0  ;;  %1684 = vrsqrt.f32 %v507_v58  ;;  %v609_v39 = vmul.f32 %v2061_v52, %v570_v60  ;;  %v1195_v45 = vld [vmem:[%s2688_s1 + $0x70] sm:$0xff]  ;;  %v1192_v58 = vld [vmem:[%s2688_s1 + $0x58] sm:$0xff]  ;;  %v1194_v7 = vld [vmem:[%s2688_s1 + $0x68] sm:$0xff] }
 0x113   :  { %v510_v30 = vadd.f32 1e-05, %v446_v4  ;;  %v608_v1 = vmul.f32 %v2061_v52, %v569_v42  ;;  %v665_v2 = vpack.c.bf16 %v646_v25, %v645_v28  ;;  %v1199_v49 = vld [vmem:[%s2688_s1 + $0x90] sm:$0xff]  ;;  %1260 = vperm.xlu0 %1614, %v1190_v27   ;;  %v1205_v55 = vld [vmem:[%s2688_s1 + $0xc0] sm:$0xff]  ;;  %v1196_v25 = vld [vmem:[%s2688_s1 + $0x78] sm:$0xff] }
 0x114   :  { %v509_v62 = vadd.f32 1e-05, %v445_v36  ;;  %v648_v53 = vadd.f32 %v2074_v61, %v609_v39  ;;  %v1203_v38 = vld [vmem:[%s2688_s1 + $0xb0] sm:$0xff]  ;;  %v2448_v24 = vld [vmem:[%s2689_s5] ss:$0 sm:$0xff] }
 0x115   :  { %1686 = vrsqrt.f32 %v510_v30  ;;  %v647_v34 = vadd.f32 %v2074_v61, %v608_v1  ;;  %1541 = vmatprep.mubr.msk.bf16.mxu0 %vm62_vm0, %v665_v2  ;;  %v1207_v36 = vld [vmem:[%s2688_s1 + $0xd0] sm:$0xff] }
 0x116   :  { %1688 = vrsqrt.f32 %v509_v62  ;;  %v1198_v62 = vld [vmem:[%s2688_s1 + $0x88] sm:$0xff] }
 0x117   :  { %v666_v47 = vpack.c.bf16 %v648_v53, %v647_v34  ;;  %1270 = vperm.xlu0 %1614, %v1192_v58  }
 0x119   :  { %1542 = vmatmul.mubr.msk.bf16.gmra.mrb[24].mxu0 %vm62_vm0, %v666_v47 }
 0x11b   :  { %v1683_v31 = vpop.eup %1682  ;;  %1280 = vperm.xlu0 %1614, %v1194_v7  }
 0x11c   :  { %v1685_v11 = vpop.eup %1684  ;;  %v572_v54 = vmul.f32 %v1683_v31, %v476_v29  ;;  %v1200_v29 = vld [vmem:[%s2688_s1 + $0x98] sm:$0xff] }
 0x11d   :  { %v571_v59 = vmul.f32 %v1685_v11, %v475_v8  ;;  %v1202_v8 = vld [vmem:[%s2688_s1 + $0xa8] sm:$0xff]  ;;  %v1204_v11 = vld [vmem:[%s2688_s1 + $0xb8] sm:$0xff] }
 0x11e   :  { %v611_v32 = vmul.f32 %v2061_v52, %v572_v54 }
 0x11f   :  { %v1687_v43 = vpop.eup %1686  ;;  %v610_v0 = vmul.f32 %v2061_v52, %v571_v59  ;;  %1290 = vperm.xlu0 %1614, %v1196_v25  }
 0x120   :  { %v1689_v12 = vpop.eup %1688  ;;  %v650_v13 = vadd.f32 %v2074_v61, %v611_v32  ;;  %v574_v20 = vmul.f32 %v1687_v43, %v478_v5 }
 0x121   :  { %v649_v33 = vadd.f32 %v2074_v61, %v610_v0  ;;  %v573_v63 = vmul.f32 %v1689_v12, %v477_v56  ;;  %v1206_v56 = vld [vmem:[%s2688_s1 + $0xc8] sm:$0xff] }
 0x122   :  { %v613_v44 = vmul.f32 %v2061_v52, %v574_v20 }
 0x123   :  { %v667_v35 = vpack.c.bf16 %v650_v13, %v649_v33  ;;  %v612_v15 = vmul.f32 %v2061_v52, %v573_v63  ;;  %v1183_v52 = vld [vmem:[%s2688_s1 + $0x10] sm:$0xff]  ;;  %1300 = vperm.xlu0 %1614, %v1198_v62  }
 0x124   :  { %v652_v18 = vadd.f32 %v2074_v61, %v613_v44  ;;  %1225 = vperm.xlu1 %1615, %v1183_v52   ;;  %v1208_v44 = vld [vmem:[%s2688_s1 + $0xd8] sm:$0xff] }
 0x125   :  { %1545 = vmatprep.mubr.msk.bf16.mxu0 %vm62_vm0, %v667_v35  ;;  %v651_v17 = vadd.f32 %v2074_v61, %v612_v15  ;;  %v1184_v61 = vld [vmem:[%s2688_s1 + $0x18] sm:$0xff]  ;;  %v1210_v15 = vld [vmem:[%s2688_s1 + $0xe8] sm:$0xff] }
 0x127   :  { %v668_v48 = vpack.c.bf16 %v652_v18, %v651_v17  ;;  %1310 = vperm.xlu0 %1614, %v1200_v29   ;;  %v1212_v18 = vld [vmem:[%s2688_s1 + $0xf8] sm:$0xff] }
 0x128   :  { %1230 = vperm.xlu1 %1615, %v1184_v61  }
 0x129   :  { %1546 = vmatmul.mubr.msk.bf16.gmra.mrb[28].mxu0 %vm62_vm0, %v668_v48 }
 0x12b   :  { %1320 = vperm.xlu0 %1614, %v1202_v8  }
 0x12c   :  { %1235 = vperm.xlu1 %1615, %v1185_v40  }
 0x12f   :  { %1330 = vperm.xlu0 %1614, %v1204_v11  }
 0x130   :  { %1240 = vperm.xlu1 %1615, %v1186_v19  }
 0x133   :  { %1340 = vperm.xlu0 %1614, %v1206_v56  }
 0x134   :  { %1245 = vperm.xlu1 %1615, %v1187_v22  }
 0x137   :  { %1350 = vperm.xlu0 %1614, %v1208_v44  }
 0x138   :  { %1250 = vperm.xlu1 %1615, %v1188_v23  }
 0x13b   :  { %1360 = vperm.xlu0 %1614, %v1210_v15  }
 0x13c   :  { %1255 = vperm.xlu1 %1615, %v1189_v6  }
 0x13f   :  { %1370 = vperm.xlu0 %1614, %v1212_v18  }
 0x140   :  { %1265 = vperm.xlu1 %1615, %v1191_v51  }
 0x144   :  { %1275 = vperm.xlu1 %1615, %v1193_v50  }
 0x148   :  { %1285 = vperm.xlu1 %1615, %v1195_v45  }
 0x14c   :  { %1295 = vperm.xlu1 %1615, %v1197_v21  }
 0x150   :  { %1305 = vperm.xlu1 %1615, %v1199_v49  }
 0x154   :  { %1315 = vperm.xlu1 %1615, %v1201_v41  }
 0x158   :  { %1325 = vperm.xlu1 %1615, %v1203_v38  }
 0x15c   :  { %1335 = vperm.xlu1 %1615, %v1205_v55  }
 0x160   :  { %1345 = vperm.xlu1 %1615, %v1207_v36  }
 0x164   :  { %1355 = vperm.xlu1 %1615, %v1209_v10  }
 0x168   :  { %1365 = vperm.xlu1 %1615, %v1211_v37  }
 0x18c   :  { %v1519_v60 = vpop.f32.mrb[0].mxu0 }
 0x18d   :  { %v783_v14 = vadd.f32 %v1519_v60, %v2448_v24  ;;  %v774_v4 = vpop.f32.mrb[1].mxu0 }
 0x18e   :  { %v775_v42 = vadd.f32 %v2448_v24, %v774_v4  ;;  %v1520_v28 = vpop.f32.mrb[2].mxu0 }
 0x18f   :  { %v786_v39 = vadd.f32 %v1520_v28, %v2448_v24  ;;  %v777_v30 = vpop.f32.mrb[3].mxu0  ;;  %v903_v2 = vmax.f32 %v783_v14, 0.0 }
 0x190   :  { %v778_v1 = vadd.f32 %v2448_v24, %v777_v30  ;;  %v901_v34 = vmax.f32 %v775_v42, 0.0 }
 0x191   :  { %v904_v53 = vmax.f32 %v786_v39, 0.0 }
 0x192   :  { %v902_v47 = vmax.f32 %v778_v1, 0.0 }
 0x193   :  { %v934_v16 = vpack.c.bf16 %v904_v53, %v903_v2 }
 0x194   :  { %v933_v31 = vpack.c.bf16 %v902_v47, %v901_v34 }
 0x196   :  { %1565 = vmatprep.mubr.bf16.mxu0 %v933_v31 }
 0x197   :  { %1566 = vmatmul.mubr.bf16.vlgmr.msra.gmra.mrb[32].mxu0 %v934_v16 }
 0x19c   :  { %v1523_v54 = vpop.f32.mrb[4].mxu0 }
 0x19d   :  { %v799_v59 = vadd.f32 %v1523_v54, %v2448_v24  ;;  %v790_v9 = vpop.f32.mrb[5].mxu0 }
 0x19e   :  { %v791_v5 = vadd.f32 %v2448_v24, %v790_v9  ;;  %v1524_v32 = vpop.f32.mrb[6].mxu0 }
 0x19f   :  { %v802_v43 = vadd.f32 %v1524_v32, %v2448_v24  ;;  %v793_v3 = vpop.f32.mrb[7].mxu0  ;;  %v907_v12 = vmax.f32 %v799_v59, 0.0 }
 0x1a0   :  { %v794_v0 = vadd.f32 %v2448_v24, %v793_v3  ;;  %v905_v20 = vmax.f32 %v791_v5, 0.0 }
 0x1a1   :  { %v908_v13 = vmax.f32 %v802_v43, 0.0 }
 0x1a2   :  { %v906_v33 = vmax.f32 %v794_v0, 0.0 }
 0x1a3   :  { %v936_v63 = vpack.c.bf16 %v908_v13, %v907_v12 }
 0x1a4   :  { %v935_v35 = vpack.c.bf16 %v906_v33, %v905_v20 }
 0x1a6   :  { %1569 = vmatprep.mubr.bf16.mxu1 %v935_v35 }
 0x1a7   :  { %1570 = vmatmul.mubr.bf16.vlgmr.msra.gmra.mrb[0].mxu1 %v936_v63 }
 0x1ac   :  { %v1527_v17 = vpop.f32.mrb[8].mxu0 }
 0x1ad   :  { %v815_v48 = vadd.f32 %v1527_v17, %v2448_v24  ;;  %v806_v46 = vpop.f32.mrb[9].mxu0 }
 0x1ae   :  { %v807_v57 = vadd.f32 %v2448_v24, %v806_v46  ;;  %v1528_v52 = vpop.f32.mrb[10].mxu0 }
 0x1af   :  { %v818_v61 = vadd.f32 %v1528_v52, %v2448_v24  ;;  %v809_v40 = vpop.f32.mrb[11].mxu0  ;;  %v911_v22 = vmax.f32 %v815_v48, 0.0 }
 0x1b0   :  { %v810_v19 = vadd.f32 %v2448_v24, %v809_v40  ;;  %v909_v6 = vmax.f32 %v807_v57, 0.0 }
 0x1b1   :  { %v912_v23 = vmax.f32 %v818_v61, 0.0 }
 0x1b2   :  { %v910_v26 = vmax.f32 %v810_v19, 0.0 }
 0x1b3   :  { %v938_v51 = vpack.c.bf16 %v912_v23, %v911_v22 }
 0x1b4   :  { %v937_v50 = vpack.c.bf16 %v910_v26, %v909_v6 }
 0x1b6   :  { %1573 = vmatprep.mubr.bf16.mxu1 %v937_v50 }
 0x1b7   :  { %1574 = vmatmul.mubr.bf16.gmra.mrb[4].mxu1 %v938_v51 }
 0x1bc   :  { %v1531_v45 = vpop.f32.mrb[12].mxu0 }
 0x1bd   :  { %v831_v21 = vadd.f32 %v1531_v45, %v2448_v24  ;;  %v822_v49 = vpop.f32.mrb[13].mxu0 }
 0x1be   :  { %v823_v41 = vadd.f32 %v2448_v24, %v822_v49  ;;  %v1532_v27 = vpop.f32.mrb[14].mxu0 }
 0x1bf   :  { %v834_v58 = vadd.f32 %v1532_v27, %v2448_v24  ;;  %v825_v38 = vpop.f32.mrb[15].mxu0  ;;  %v915_v55 = vmax.f32 %v831_v21, 0.0 }
 0x1c0   :  { %v826_v7 = vadd.f32 %v2448_v24, %v825_v38  ;;  %v913_v60 = vmax.f32 %v823_v41, 0.0 }
 0x1c1   :  { %v916_v25 = vmax.f32 %v834_v58, 0.0 }
 0x1c2   :  { %v914_v14 = vmax.f32 %v826_v7, 0.0  ;;  %v1221_v7 = vpop.permute.xlu1 %1220 }
 0x1c3   :  { %v940_v4 = vpack.c.bf16 %v916_v25, %v915_v55 }
 0x1c4   :  { %v939_v36 = vpack.c.bf16 %v914_v14, %v913_v60  ;;  %v2521_v60 = vld [vmem:[%s2690_s7] ss:$0 sm:$0xff] }
 0x1c6   :  { %1577 = vmatprep.mubr.bf16.mxu1 %v939_v36  ;;  %v1226_v55 = vpop.permute.xlu1 %1225  ;;  %v1216_v36 = vpop.permute.xlu0 %1215 }
 0x1c7   :  { %1578 = vmatmul.mubr.bf16.gmra.mrb[8].mxu1 %v940_v4 }
 0x1ca   :  { %v1231_v25 = vpop.permute.xlu1 %1230 }
 0x1cc   :  { %v1535_v42 = vpop.f32.mrb[16].mxu0 }
 0x1cd   :  { %v847_v28 = vadd.f32 %v1535_v42, %v2448_v24  ;;  %v838_v39 = vpop.f32.mrb[17].mxu0 }
 0x1ce   :  { %v839_v30 = vadd.f32 %v2448_v24, %v838_v39  ;;  %v1536_v62 = vpop.f32.mrb[18].mxu0  ;;  %v1236_v42 = vpop.permute.xlu1 %1235 }
 0x1cf   :  { %v850_v1 = vadd.f32 %v1536_v62, %v2448_v24  ;;  %v841_v2 = vpop.f32.mrb[19].mxu0  ;;  %v919_v10 = vmax.f32 %v847_v28, 0.0 }
 0x1d0   :  { %v842_v53 = vadd.f32 %v2448_v24, %v841_v2  ;;  %v917_v47 = vmax.f32 %v839_v30, 0.0 }
 0x1d1   :  { %v920_v34 = vmax.f32 %v850_v1, 0.0 }
 0x1d2   :  { %v918_v16 = vmax.f32 %v842_v53, 0.0 }
 0x1d3   :  { %v942_v29 = vpack.c.bf16 %v920_v34, %v919_v10 }
 0x1d4   :  { %v941_v31 = vpack.c.bf16 %v918_v16, %v917_v47  ;;  %v1241_v47 = vpop.permute.xlu1 %1240 }
 0x1d6   :  { %1581 = vmatprep.mubr.bf16.mxu1 %v941_v31 }
 0x1d7   :  { %1582 = vmatmul.mubr.bf16.gmra.mrb[12].mxu1 %v942_v29 }
 0x1d8   :  { %v1246_v16 = vpop.permute.xlu1 %1245 }
 0x1dc   :  { %v1539_v37 = vpop.f32.mrb[20].mxu0 }
 0x1dd   :  { %v863_v8 = vadd.f32 %v1539_v37, %v2448_v24  ;;  %v854_v11 = vpop.f32.mrb[21].mxu0 }
 0x1de   :  { %v855_v54 = vadd.f32 %v2448_v24, %v854_v11  ;;  %v1540_v59 = vpop.f32.mrb[22].mxu0 }
 0x1df   :  { %v866_v9 = vadd.f32 %v1540_v59, %v2448_v24  ;;  %v857_v5 = vpop.f32.mrb[23].mxu0  ;;  %v923_v43 = vmax.f32 %v863_v8, 0.0 }
 0x1e0   :  { %v858_v32 = vadd.f32 %v2448_v24, %v857_v5  ;;  %v921_v56 = vmax.f32 %v855_v54, 0.0  ;;  %v1251_v5 = vpop.permute.xlu1 %1250 }
 0x1e1   :  { %v924_v3 = vmax.f32 %v866_v9, 0.0 }
 0x1e2   :  { %v922_v0 = vmax.f32 %v858_v32, 0.0 }
 0x1e3   :  { %v944_v12 = vpack.c.bf16 %v924_v3, %v923_v43 }
 0x1e4   :  { %v943_v13 = vpack.c.bf16 %v922_v0, %v921_v56  ;;  %v1256_v0 = vpop.permute.xlu1 %1255 }
 0x1e6   :  { %1585 = vmatprep.mubr.bf16.mxu1 %v943_v13 }
 0x1e7   :  { %1586 = vmatmul.mubr.bf16.gmra.mrb[16].mxu1 %v944_v12  ;;  %v1261_v12 = vpop.permute.xlu0 %1260 }
 0x1ec   :  { %v1543_v20 = vpop.f32.mrb[24].mxu0 }
 0x1ed   :  { %v879_v33 = vadd.f32 %v1543_v20, %v2448_v24  ;;  %v870_v63 = vpop.f32.mrb[25].mxu0 }
 0x1ee   :  { %v871_v44 = vadd.f32 %v2448_v24, %v870_v63  ;;  %v1544_v35 = vpop.f32.mrb[26].mxu0  ;;  %v1266_v63 = vpop.permute.xlu1 %1265 }
 0x1ef   :  { %v882_v15 = vadd.f32 %v1544_v35, %v2448_v24  ;;  %v873_v18 = vpop.f32.mrb[27].mxu0  ;;  %v927_v48 = vmax.f32 %v879_v33, 0.0 }
 0x1f0   :  { %v874_v17 = vadd.f32 %v2448_v24, %v873_v18  ;;  %v925_v57 = vmax.f32 %v871_v44, 0.0 }
 0x1f1   :  { %v928_v46 = vmax.f32 %v882_v15, 0.0 }
 0x1f2   :  { %v926_v52 = vmax.f32 %v874_v17, 0.0 }
 0x1f3   :  { %v946_v61 = vpack.c.bf16 %v928_v46, %v927_v48  ;;  %v1271_v48 = vpop.permute.xlu0 %1270 }
 0x1f4   :  { %v945_v40 = vpack.c.bf16 %v926_v52, %v925_v57 }
 0x1f6   :  { %1589 = vmatprep.mubr.bf16.mxu1 %v945_v40  ;;  %v1276_v40 = vpop.permute.xlu1 %1275 }
 0x1f7   :  { %1590 = vmatmul.mubr.bf16.gmra.mrb[20].mxu1 %v946_v61 }
 0x1fc   :  { %v1547_v19 = vpop.f32.mrb[28].mxu0 }
 0x1fd   :  { %v895_v22 = vadd.f32 %v1547_v19, %v2448_v24  ;;  %v886_v23 = vpop.f32.mrb[29].mxu0  ;;  %v1281_v19 = vpop.permute.xlu0 %1280 }
 0x1fe   :  { %v887_v6 = vadd.f32 %v2448_v24, %v886_v23  ;;  %v1548_v26 = vpop.f32.mrb[30].mxu0 }
 0x1ff   :  { %v898_v51 = vadd.f32 %v1548_v26, %v2448_v24  ;;  %v889_v50 = vpop.f32.mrb[31].mxu0  ;;  %v931_v21 = vmax.f32 %v895_v22, 0.0  ;;  %v1286_v26 = vpop.permute.xlu1 %1285 }
 0x200   :  { %v890_v45 = vadd.f32 %v2448_v24, %v889_v50  ;;  %v929_v41 = vmax.f32 %v887_v6, 0.0 }
 0x201   :  { %v932_v49 = vmax.f32 %v898_v51, 0.0 }
 0x202   :  { %v930_v27 = vmax.f32 %v890_v45, 0.0 }
 0x203   :  { %v948_v58 = vpack.c.bf16 %v932_v49, %v931_v21 }
 0x204   :  { %v947_v38 = vpack.c.bf16 %v930_v27, %v929_v41  ;;  %v1291_v41 = vpop.permute.xlu0 %1290 }
 0x206   :  { %1593 = vmatprep.mubr.bf16.mxu1 %v947_v38 }
 0x207   :  { %1594 = vmatmul.mubr.bf16.gmra.mrb[24].mxu1 %v948_v58 }
 0x26a   :  { %v1567_v14 = vpop.f32.mrb[32].mxu0 }
 0x26b   :  { %v1063_v4 = vadd.f32 %v1567_v14, %v2521_v60  ;;  %v1054_v24 = vpop.f32.mrb[33].mxu0 }
 0x26c   :  { %v1055_v28 = vadd.f32 %v2521_v60, %v1054_v24  ;;  %v1568_v39 = vpop.f32.mrb[34].mxu0 }
 0x26d   :  { %v1375_v30 = vmul.f32 %v1226_v55, %v1063_v4  ;;  %v1066_v62 = vadd.f32 %v1568_v39, %v2521_v60  ;;  %v1057_v1 = vpop.f32.mrb[35].mxu0  ;;  %v1296_v55 = vpop.permute.xlu1 %1295 }
 0x26e   :  { %v1058_v2 = vadd.f32 %v2521_v60, %v1057_v1  ;;  %v1373_v53 = vmul.f32 %v1216_v36, %v1055_v28 }
 0x26f   :  { %1407 = vst.msk [vmem:[%s2691_s8 + $0x10] sm:$0xff] %vm62_vm0, %v1375_v30  ;;  %v1376_v10 = vmul.f32 %v1231_v25, %v1066_v62  ;;  %v1301_v25 = vpop.permute.xlu0 %1300 }
 0x270   :  { %v1374_v34 = vmul.f32 %v1221_v7, %v1058_v2  ;;  %1405 = vst.msk [vmem:[%s2691_s8] sm:$0xff] %vm62_vm0, %v1373_v53 }
 0x271   :  { %1408 = vst.msk [vmem:[%s2691_s8 + $0x18] sm:$0xff] %vm62_vm0, %v1376_v10  ;;  %v1306_v36 = vpop.permute.xlu1 %1305 }
 0x272   :  { %1406 = vst.msk [vmem:[%s2691_s8 + $0x8] sm:$0xff] %vm62_vm0, %v1374_v34 }
 0x273   :  { %v1311_v1 = vpop.permute.xlu0 %1310 }
 0x27a   :  { %v1571_v29 = vpop.f32.mrb[0].mxu1 }
 0x27b   :  { %v1079_v31 = vadd.f32 %v1571_v29, %v2521_v60  ;;  %v1070_v37 = vpop.f32.mrb[1].mxu1 }
 0x27c   :  { %v1071_v8 = vadd.f32 %v2521_v60, %v1070_v37  ;;  %v1572_v11 = vpop.f32.mrb[2].mxu1 }
 0x27d   :  { %v1379_v54 = vmul.f32 %v1246_v16, %v1079_v31  ;;  %v1082_v59 = vadd.f32 %v1572_v11, %v2521_v60  ;;  %v1073_v9 = vpop.f32.mrb[3].mxu1  ;;  %v1321_v16 = vpop.permute.xlu0 %1320 }
 0x27e   :  { %v1377_v32 = vmul.f32 %v1236_v42, %v1071_v8  ;;  %v1074_v43 = vadd.f32 %v2521_v60, %v1073_v9 }
 0x27f   :  { %1411 = vst.msk [vmem:[%s2691_s8 + $0x30] sm:$0xff] %vm62_vm0, %v1379_v54  ;;  %v1380_v3 = vmul.f32 %v1251_v5, %v1082_v59 }
 0x280   :  { %1409 = vst.msk [vmem:[%s2691_s8 + $0x20] sm:$0xff] %vm62_vm0, %v1377_v32  ;;  %v1378_v56 = vmul.f32 %v1241_v47, %v1074_v43  ;;  %v1316_v47 = vpop.permute.xlu1 %1315 }
 0x281   :  { %1412 = vst.msk [vmem:[%s2691_s8 + $0x38] sm:$0xff] %vm62_vm0, %v1380_v3  ;;  %v1331_v32 = vpop.permute.xlu0 %1330 }
 0x282   :  { %1410 = vst.msk [vmem:[%s2691_s8 + $0x28] sm:$0xff] %vm62_vm0, %v1378_v56 }
 0x284   :  { %v1326_v8 = vpop.permute.xlu1 %1325 }
 0x28a   :  { %v1575_v13 = vpop.f32.mrb[4].mxu1 }
 0x28b   :  { %v1095_v20 = vadd.f32 %v1575_v13, %v2521_v60  ;;  %v1086_v33 = vpop.f32.mrb[5].mxu1  ;;  %v1341_v13 = vpop.permute.xlu0 %1340 }
 0x28c   :  { %v1087_v44 = vadd.f32 %v2521_v60, %v1086_v33  ;;  %v1576_v35 = vpop.f32.mrb[6].mxu1 }
 0x28d   :  { %v1383_v15 = vmul.f32 %v1266_v63, %v1095_v20  ;;  %v1098_v18 = vadd.f32 %v1576_v35, %v2521_v60  ;;  %v1089_v17 = vpop.f32.mrb[7].mxu1 }
 0x28e   :  { %v1381_v46 = vmul.f32 %v1256_v0, %v1087_v44  ;;  %v1090_v57 = vadd.f32 %v2521_v60, %v1089_v17 }
 0x28f   :  { %1415 = vst.msk [vmem:[%s2691_s8 + $0x50] sm:$0xff] %vm62_vm0, %v1383_v15  ;;  %v1384_v52 = vmul.f32 %v1271_v48, %v1098_v18 }
 0x290   :  { %1413 = vst.msk [vmem:[%s2691_s8 + $0x40] sm:$0xff] %vm62_vm0, %v1381_v46  ;;  %v1382_v61 = vmul.f32 %v1261_v12, %v1090_v57  ;;  %v1336_v12 = vpop.permute.xlu1 %1335  ;;  %v1351_v46 = vpop.permute.xlu0 %1350 }
 0x291   :  { %1416 = vst.msk [vmem:[%s2691_s8 + $0x58] sm:$0xff] %vm62_vm0, %v1384_v52 }
 0x292   :  { %1414 = vst.msk [vmem:[%s2691_s8 + $0x48] sm:$0xff] %vm62_vm0, %v1382_v61 }
 0x294   :  { %v1346_v44 = vpop.permute.xlu1 %1345 }
 0x29a   :  { %v1579_v22 = vpop.f32.mrb[8].mxu1 }
 0x29b   :  { %v1111_v23 = vadd.f32 %v1579_v22, %v2521_v60  ;;  %v1102_v6 = vpop.f32.mrb[9].mxu1  ;;  %v1361_v22 = vpop.permute.xlu0 %1360 }
 0x29c   :  { %v1103_v51 = vadd.f32 %v2521_v60, %v1102_v6  ;;  %v1580_v50 = vpop.f32.mrb[10].mxu1 }
 0x29d   :  { %v1387_v45 = vmul.f32 %v1286_v26, %v1111_v23  ;;  %v1114_v21 = vadd.f32 %v1580_v50, %v2521_v60  ;;  %v1105_v49 = vpop.f32.mrb[11].mxu1 }
 0x29e   :  { %v1385_v27 = vmul.f32 %v1276_v40, %v1103_v51  ;;  %v1106_v58 = vadd.f32 %v2521_v60, %v1105_v49 }
 0x29f   :  { %1419 = vst.msk [vmem:[%s2691_s8 + $0x70] sm:$0xff] %vm62_vm0, %v1387_v45  ;;  %v1388_v38 = vmul.f32 %v1291_v41, %v1114_v21 }
 0x2a0   :  { %1417 = vst.msk [vmem:[%s2691_s8 + $0x60] sm:$0xff] %vm62_vm0, %v1385_v27  ;;  %v1386_v7 = vmul.f32 %v1281_v19, %v1106_v58  ;;  %v1356_v19 = vpop.permute.xlu1 %1355  ;;  %v1371_v27 = vpop.permute.xlu0 %1370 }
 0x2a1   :  { %1420 = vst.msk [vmem:[%s2691_s8 + $0x78] sm:$0xff] %vm62_vm0, %v1388_v38 }
 0x2a2   :  { %1418 = vst.msk [vmem:[%s2691_s8 + $0x68] sm:$0xff] %vm62_vm0, %v1386_v7 }
 0x2a4   :  { %v1366_v51 = vpop.permute.xlu1 %1365 }
 0x2aa   :  { %v1583_v14 = vpop.f32.mrb[12].mxu1 }
 0x2ab   :  { %v1127_v4 = vadd.f32 %v1583_v14, %v2521_v60  ;;  %v1118_v24 = vpop.f32.mrb[13].mxu1 }
 0x2ac   :  { %v1119_v42 = vadd.f32 %v2521_v60, %v1118_v24  ;;  %v1584_v28 = vpop.f32.mrb[14].mxu1 }
 0x2ad   :  { %v1391_v39 = vmul.f32 %v1306_v36, %v1127_v4  ;;  %v1130_v30 = vadd.f32 %v1584_v28, %v2521_v60  ;;  %v1121_v62 = vpop.f32.mrb[15].mxu1 }
 0x2ae   :  { %v1389_v2 = vmul.f32 %v1296_v55, %v1119_v42  ;;  %v1122_v53 = vadd.f32 %v2521_v60, %v1121_v62 }
 0x2af   :  { %1423 = vst.msk [vmem:[%s2691_s8 + $0x90] sm:$0xff] %vm62_vm0, %v1391_v39  ;;  %v1392_v10 = vmul.f32 %v1311_v1, %v1130_v30 }
 0x2b0   :  { %1421 = vst.msk [vmem:[%s2691_s8 + $0x80] sm:$0xff] %vm62_vm0, %v1389_v2  ;;  %v1390_v34 = vmul.f32 %v1301_v25, %v1122_v53 }
 0x2b1   :  { %1424 = vst.msk [vmem:[%s2691_s8 + $0x98] sm:$0xff] %vm62_vm0, %v1392_v10 }
 0x2b2   :  { %1422 = vst.msk [vmem:[%s2691_s8 + $0x88] sm:$0xff] %vm62_vm0, %v1390_v34 }
 0x2ba   :  { %v1587_v29 = vpop.f32.mrb[16].mxu1 }
 0x2bb   :  { %v1143_v31 = vadd.f32 %v1587_v29, %v2521_v60  ;;  %v1134_v37 = vpop.f32.mrb[17].mxu1 }
 0x2bc   :  { %v1135_v11 = vadd.f32 %v2521_v60, %v1134_v37  ;;  %v1588_v54 = vpop.f32.mrb[18].mxu1 }
 0x2bd   :  { %v1395_v59 = vmul.f32 %v1326_v8, %v1143_v31  ;;  %v1146_v9 = vadd.f32 %v1588_v54, %v2521_v60  ;;  %v1137_v5 = vpop.f32.mrb[19].mxu1 }
 0x2be   :  { %v1393_v43 = vmul.f32 %v1316_v47, %v1135_v11  ;;  %v1138_v3 = vadd.f32 %v2521_v60, %v1137_v5 }
 0x2bf   :  { %1427 = vst.msk [vmem:[%s2691_s8 + $0xb0] sm:$0xff] %vm62_vm0, %v1395_v59  ;;  %v1396_v56 = vmul.f32 %v1331_v32, %v1146_v9 }
 0x2c0   :  { %1425 = vst.msk [vmem:[%s2691_s8 + $0xa0] sm:$0xff] %vm62_vm0, %v1393_v43  ;;  %v1394_v0 = vmul.f32 %v1321_v16, %v1138_v3 }
 0x2c1   :  { %1428 = vst.msk [vmem:[%s2691_s8 + $0xb8] sm:$0xff] %vm62_vm0, %v1396_v56 }
 0x2c2   :  { %1426 = vst.msk [vmem:[%s2691_s8 + $0xa8] sm:$0xff] %vm62_vm0, %v1394_v0 }
 0x2ca   :  { %v1591_v20 = vpop.f32.mrb[20].mxu1 }
 0x2cb   :  { %v1159_v33 = vadd.f32 %v1591_v20, %v2521_v60  ;;  %v1150_v63 = vpop.f32.mrb[21].mxu1 }
 0x2cc   :  { %v1151_v35 = vadd.f32 %v2521_v60, %v1150_v63  ;;  %v1592_v15 = vpop.f32.mrb[22].mxu1 }
 0x2cd   :  { %v1399_v18 = vmul.f32 %v1346_v44, %v1159_v33  ;;  %v1162_v17 = vadd.f32 %v1592_v15, %v2521_v60  ;;  %v1153_v48 = vpop.f32.mrb[23].mxu1 }
 0x2ce   :  { %v1397_v57 = vmul.f32 %v1336_v12, %v1151_v35  ;;  %v1154_v52 = vadd.f32 %v2521_v60, %v1153_v48 }
 0x2cf   :  { %1431 = vst.msk [vmem:[%s2691_s8 + $0xd0] sm:$0xff] %vm62_vm0, %v1399_v18  ;;  %v1400_v61 = vmul.f32 %v1351_v46, %v1162_v17 }
 0x2d0   :  { %1429 = vst.msk [vmem:[%s2691_s8 + $0xc0] sm:$0xff] %vm62_vm0, %v1397_v57  ;;  %v1398_v40 = vmul.f32 %v1341_v13, %v1154_v52 }
 0x2d1   :  { %1432 = vst.msk [vmem:[%s2691_s8 + $0xd8] sm:$0xff] %vm62_vm0, %v1400_v61 }
 0x2d2   :  { %1430 = vst.msk [vmem:[%s2691_s8 + $0xc8] sm:$0xff] %vm62_vm0, %v1398_v40 }
 0x2da   :  { %v1595_v23 = vpop.f32.mrb[24].mxu1 }
 0x2db   :  { %v1175_v6 = vadd.f32 %v1595_v23, %v2521_v60  ;;  %v1166_v26 = vpop.f32.mrb[25].mxu1 }
 0x2dc   :  { %v1167_v50 = vadd.f32 %v2521_v60, %v1166_v26  ;;  %v1596_v45 = vpop.f32.mrb[26].mxu1 }
 0x2dd   :  { %v1403_v21 = vmul.f32 %v1366_v51, %v1175_v6  ;;  %v1178_v49 = vadd.f32 %v1596_v45, %v2521_v60  ;;  %v1169_v41 = vpop.f32.mrb[27].mxu1 }
 0x2de   :  { %v1401_v58 = vmul.f32 %v1356_v19, %v1167_v50  ;;  %v1170_v38 = vadd.f32 %v2521_v60, %v1169_v41 }
 0x2df   :  { %1435 = vst.msk [vmem:[%s2691_s8 + $0xf0] sm:$0xff] %vm62_vm0, %v1403_v21  ;;  %v1404_v7 = vmul.f32 %v1371_v27, %v1178_v49 }
 0x2e0   :  { %1433 = vst.msk [vmem:[%s2691_s8 + $0xe0] sm:$0xff] %vm62_vm0, %v1401_v58  ;;  %v1402_v55 = vmul.f32 %v1361_v22, %v1170_v38 }
 0x2e1   :  { %1436 = vst.msk [vmem:[%s2691_s8 + $0xf8] sm:$0xff] %vm62_vm0, %v1404_v7 }
 0x2e2   :  { %1434 = vst.msk [vmem:[%s2691_s8 + $0xe8] sm:$0xff] %vm62_vm0, %v1402_v55 }

</bundles_post_ra>
